<compile_context>
chip_gen: v5e
topology: v5e:2x2
jax: 0.10.0
libtpu: 0.0.40
codegen_flags: <defaults>
</compile_context>

<pallas_src>
import functools

import jax
import jax.numpy as jnp
from jax import lax
from jax.experimental import pallas as pl
from jax.experimental.pallas import tpu as pltpu

_EPSILON = 1e-05
_LANE = 128


# ------------------------------ small helpers ------------------------------ #

def _round_up(x, m):
    return (x + m - 1) // m * m


def _m_tiling(m, target=512):
    """M tile (multiple of 16, bf16-sublane friendly) + padded M.

    Guarantees >= 2 M tiles whenever m > 16 so both v7x TensorCores get work on
    the "parallel" M grid axis (no effect on single-TC v5e/v6e).
    """
    mt = _round_up(m, 16)
    if mt <= 16:
        return mt, mt
    tm = min(target, _round_up((mt + 1) // 2, 16))
    return tm, _round_up(mt, tm)


def _k_tile(kp, target=512):
    for t in (target, 384, 256, 128):
        if t <= kp and kp % t == 0:
            return t
    return kp


def _n_tile(np_):
    for t in (512, 256, _LANE):
        if np_ % t == 0:
            return t
    return np_


def _pad_vec(v, n):
    v = v.astype(jnp.float32)
    return jnp.pad(v, (0, n - v.shape[0]))


def _stats_block(su, sq):
    """Pack (1, tn) sum / sumsq rows into a sublane-aligned (8, tn) block."""
    rid = lax.broadcasted_iota(jnp.int32, (8, su.shape[1]), 0)
    return jnp.where(rid == 0, su, 0.0) + jnp.where(rid == 1, sq, 0.0)


# ----------------------------- Pallas kernels ------------------------------ #

def _fused_conv_kernel(*refs, tm, m_true, with_prologue, with_stats,
                       with_residual):
    """Tiled matmul with optional fused BN/mask/ReLU prologue and epilogues.

    grid = (M tiles, N tiles, K tiles); K is the reduction ("arbitrary") axis.
    prologue (optional):  a = relu(a * in_scale + in_bias)   (per-K vectors)
    epilogue (optional):  per-channel stats (sum/sumsq over valid rows) and/or
                          residual-add + per-channel output mask.
    """
    idx = 0
    a_ref = refs[idx]; idx += 1
    w_ref = refs[idx]; idx += 1
    if with_prologue:
        s_in_ref = refs[idx]; idx += 1
        b_in_ref = refs[idx]; idx += 1
    if with_residual:
        r_ref = refs[idx]; idx += 1
        m_out_ref = refs[idx]; idx += 1
    y_ref = refs[idx]; idx += 1
    if with_stats:
        st_ref = refs[idx]; idx += 1
    acc_ref = refs[idx]

    # Read program ids once at the top level of the body; never bind program_id
    # inside a pl.when branch (no cond-branch lowering on the interpret path).
    i = pl.program_id(0)
    k = pl.program_id(2)
    nk = pl.num_programs(2)

    @pl.when(k == 0)
    def _():
        acc_ref[...] = jnp.zeros_like(acc_ref)

    a = a_ref[...]
    if with_prologue:
        # TODO(synk): on v6e/v7x this prologue could run in bf16 (halved VALU work); kept f32 so one kernel is numerically safe on v5e too.
        a = jnp.maximum(a.astype(jnp.float32) * s_in_ref[...] + b_in_ref[...],
                        0.0).astype(jnp.bfloat16)
    acc_ref[...] += jnp.dot(a, w_ref[...], preferred_element_type=jnp.float32)

    @pl.when(k == nk - 1)
    def _():
        acc = acc_ref[...]
        if with_stats:
            # mask out rows that are only M padding so batch stats stay exact.
            row = i * tm + lax.broadcasted_iota(jnp.int32, acc.shape, 0)
            av = jnp.where(row < m_true, acc, 0.0)
            su = jnp.sum(av, axis=0, keepdims=True)
            sq = jnp.sum(av * av, axis=0, keepdims=True)
            st_ref[...] = _stats_block(su, sq)
        y = acc
        if with_residual:
            y = (y + r_ref[...].astype(jnp.float32)) * m_out_ref[...]
        y_ref[...] = y.astype(y_ref.dtype)


def _channel_stats_kernel(x_ref, st_ref):
    """Per-channel sum / sumsq over tiled M (resident (8, C) accumulator)."""
    i = pl.program_id(0)
    x = x_ref[...].astype(jnp.float32)
    su = jnp.sum(x, axis=0, keepdims=True)
    sq = jnp.sum(x * x, axis=0, keepdims=True)
    blk = _stats_block(su, sq)

    @pl.when(i == 0)
    def _():
        st_ref[...] = blk

    @pl.when(i != 0)
    def _():
        st_ref[...] = st_ref[...] + blk


# ----------------------------- kernel wrappers ------------------------------ #

def channel_stats(x2d, tm):
    """Returns (sum, sumsq) per channel of a (Mp, Cp) array (padded rows are 0)."""
    mp, cp = x2d.shape
    nm = mp // tm
    st = pl.pallas_call(
        _channel_stats_kernel,
        out_shape=jax.ShapeDtypeStruct((8, cp), jnp.float32),
        grid_spec=pltpu.PrefetchScalarGridSpec(
            num_scalar_prefetch=0,
            grid=(nm,),
            in_specs=[pl.BlockSpec((tm, cp), lambda i: (i, 0))],
            out_specs=pl.BlockSpec((8, cp), lambda i: (0, 0))),
        compiler_params=pltpu.CompilerParams(
            dimension_semantics=("arbitrary",)),
        cost_estimate=pl.CostEstimate(
            flops=2 * mp * cp, transcendentals=0,
            bytes_accessed=mp * cp * 2 + 8 * cp * 4),
    )(x2d)
    return st[0], st[1]


def fused_conv_matmul(a, w, in_scale=None, in_bias=None, *, residual=None,
                      out_mask=None, with_stats=False, out_dtype=jnp.bfloat16,
                      m_true, tm):
    """(Mp, Kp) @ (Kp, Np) with fused prologue/epilogue. All dims pre-padded."""
    mp, kp = a.shape
    kp2, np_ = w.shape
    assert kp == kp2 and mp % tm == 0 and np_ % _LANE == 0 and kp % _LANE == 0
    tk = _k_tile(kp)
    tn = _n_tile(np_)           # up to 512-wide: fills v6e/v7x 256-wide MXU cols
    nm, nn, nk = mp // tm, np_ // tn, kp // tk
    with_prologue = in_scale is not None
    with_residual = residual is not None

    kern = functools.partial(_fused_conv_kernel, tm=tm, m_true=m_true,
                             with_prologue=with_prologue,
                             with_stats=with_stats,
                             with_residual=with_residual)

    in_specs = [
        pl.BlockSpec((tm, tk), lambda i, j, k: (i, k)),
        pl.BlockSpec((tk, tn), lambda i, j, k: (k, j)),
    ]
    inputs = [a, w]
    if with_prologue:
        in_specs += [pl.BlockSpec((1, tk), lambda i, j, k: (0, k)),
                     pl.BlockSpec((1, tk), lambda i, j, k: (0, k))]
        inputs += [in_scale.reshape(1, kp).astype(jnp.float32),
                   in_bias.reshape(1, kp).astype(jnp.float32)]
    if with_residual:
        in_specs += [pl.BlockSpec((tm, tn), lambda i, j, k: (i, j)),
                     pl.BlockSpec((1, tn), lambda i, j, k: (0, j))]
        inputs += [residual, out_mask.reshape(1, np_).astype(jnp.float32)]

    y_shape = jax.ShapeDtypeStruct((mp, np_), out_dtype)
    y_spec = pl.BlockSpec((tm, tn), lambda i, j, k: (i, j))
    if with_stats:
        out_shape = (y_shape, jax.ShapeDtypeStruct((nm * 8, np_), jnp.float32))
        out_specs = (y_spec, pl.BlockSpec((8, tn), lambda i, j, k: (i, j)))
    else:
        out_shape = y_shape
        out_specs = y_spec

    bytes_acc = (a.size * a.dtype.itemsize * nn          # A re-streamed per N tile
                 + w.size * w.dtype.itemsize
                 + mp * np_ * jnp.dtype(out_dtype).itemsize)
    if with_prologue:
        bytes_acc += 2 * kp * 4 * nm * nn
    if with_residual:
        bytes_acc += residual.size * residual.dtype.itemsize + np_ * 4
    if with_stats:
        bytes_acc += nm * 8 * np_ * 4
    cost = pl.CostEstimate(flops=2 * mp * np_ * kp, transcendentals=0,
                           bytes_accessed=int(bytes_acc))

    out = pl.pallas_call(
        kern,
        out_shape=out_shape,
        grid_spec=pltpu.PrefetchScalarGridSpec(
            num_scalar_prefetch=0,
            grid=(nm, nn, nk),
            in_specs=in_specs,
            out_specs=out_specs,
            scratch_shapes=[pltpu.VMEM((tm, tn), jnp.float32)]),
        compiler_params=pltpu.CompilerParams(
            dimension_semantics=("parallel", "parallel", "arbitrary")),
        cost_estimate=cost,
    )(*inputs)

    if with_stats:
        y, st = out
        st = st.reshape(nm, 8, np_)
        return y, jnp.sum(st[:, 0, :], axis=0), jnp.sum(st[:, 1, :], axis=0)
    return out


# ------------------------------ DNAS gate glue ------------------------------ #

def gate_prob_mask(logits, tau):
    """prob over 'keep k+1 channels' options; rmask[c] = P(#kept > c)."""
    p = jax.nn.softmax(logits / tau)
    rmask = jnp.flip(jnp.cumsum(jnp.flip(p)))
    return p, rmask


def expected_channels(p, full):
    if p is None:
        return jnp.asarray(float(full), jnp.float32)
    k = jnp.arange(1, p.shape[0] + 1, dtype=jnp.float32)
    return jnp.sum(p * k)


def conv_flops(p_in, p_out, c_in, h_out, w_out, ksize):
    return (h_out * w_out * ksize * ksize
            * expected_channels(p_in, c_in) * expected_channels(p_out, None))


def _bn_affine(ch_sum, ch_sumsq, count, gamma, beta, mask):
    """Fold training-mode BN (batch stats, biased var) + channel mask into scale/bias."""
    # TODO(synk): E[x^2]-E[x]^2 in f32 can cancel for very large M / large means; a shifted/Welford combine of the per-tile partials would be safer.
    mean = ch_sum / count
    var = jnp.maximum(ch_sumsq / count - mean * mean, 0.0)
    inv = lax.rsqrt(var + _EPSILON)
    scale = gamma * inv * mask
    bias = (beta - mean * gamma * inv) * mask
    return scale, bias


# ---------------------------- weight / patch prep ---------------------------- #

def _prep_w_1x1(w_oihw, cinp, coutp):
    o, i = w_oihw.shape[0], w_oihw.shape[1]
    wm = jnp.transpose(w_oihw[:, :, 0, 0], (1, 0))                 # (I, O)
    wm = jnp.pad(wm, ((0, cinp - i), (0, coutp - o)))
    return wm.astype(jnp.bfloat16)


def _prep_w_3x3(w_oihw, kpad, coutp):
    """(O, I, 3, 3) -> (9*I, O); K padded once AFTER flattening the 9 taps."""
    o, i = w_oihw.shape[0], w_oihw.shape[1]
    wm = jnp.transpose(w_oihw, (2, 3, 1, 0)).reshape(9 * i, o)      # (kh*kw*I, O)
    wm = jnp.pad(wm, ((0, kpad - 9 * i), (0, coutp - o)))
    return wm.astype(jnp.bfloat16)


def _im2col_3x3(x_nhwc, stride):
    # TODO(synk): replace glue im2col with in-kernel 9-tap accumulation (per-tap index_map offsets over a spatially padded VMEM tile) to avoid the 9x HBM materialization on large feature maps.
    n, h, w, c = x_nhwc.shape
    ho = (h - 1) // stride + 1
    wo = (w - 1) // stride + 1
    xp = jnp.pad(x_nhwc, ((0, 0), (1, 1), (1, 1), (0, 0)))
    taps = []
    for kh in range(3):
        for kw in range(3):
            taps.append(xp[:, kh:kh + (ho - 1) * stride + 1:stride,
                           kw:kw + (wo - 1) * stride + 1:stride, :])
    return jnp.concatenate(taps, axis=-1)                           # (n, ho, wo, 9c)


# ------------------------------ parameter setup ------------------------------ #

def init_params(key, in_planes, out_planes_list):
    c1, c2, c3 = out_planes_list
    ks = jax.random.split(key, 7)
    norm = lambda k, shape, fan: (jax.random.normal(k, shape, jnp.float32)
                                  * (2.0 / fan) ** 0.5)
    params = {
        "bn0_gamma": jnp.ones((in_planes,), jnp.float32),
        "bn0_beta": jnp.zeros((in_planes,), jnp.float32),
        "bn1_gamma": jnp.ones((c1,), jnp.float32),
        "bn1_beta": jnp.zeros((c1,), jnp.float32),
        "bn2_gamma": jnp.ones((c2,), jnp.float32),
        "bn2_beta": jnp.zeros((c2,), jnp.float32),
        "conv1_w": norm(ks[0], (c1, in_planes, 1, 1), in_planes),
        "conv2_w": norm(ks[1], (c2, c1, 3, 3), 9 * c1),
        "conv3_w": norm(ks[2], (c3, c2, 1, 1), c2),
        "shortcut_w": norm(ks[3], (c3, in_planes, 1, 1), in_planes),
        "conv1_gate": 0.1 * jax.random.normal(ks[4], (c1,), jnp.float32),
        "conv2_gate": 0.1 * jax.random.normal(ks[5], (c2,), jnp.float32),
        "shortcut_gate": 0.1 * jax.random.normal(ks[6], (c3,), jnp.float32),
        # conv3 reuses shortcut gate (dcfg.reuse_gate = self.shortcut.gate)
    }
    return params


# --------------------------------- forward ---------------------------------- #

@functools.partial(jax.jit, static_argnames=("stride", "project"))
def bottleneck_gated_forward(params, x_nchw, tau=1.0, stride=2, project=True):
    """Mirrors BottleneckGated.forward (noise=False, reuse_prob=None, rmask=None)."""
    assert project, "only the projection (shortcut-conv) variant is implemented"
    n, c_in, h, w = x_nchw.shape
    c1 = params["conv1_w"].shape[0]
    c2 = params["conv2_w"].shape[0]
    c3 = params["conv3_w"].shape[0]
    c_in_p = _round_up(c_in, _LANE)
    c1p = _round_up(c1, _LANE)
    c2p = _round_up(c2, _LANE)
    c3p = _round_up(c3, _LANE)
    k2p = _round_up(9 * c1, _LANE)          # conv2 K padded after tap-flattening

    # NCHW -> NHWC, bf16, lane-dense channel padding.
    # TODO(synk): fold the layout change / stride subsample into the conv kernel index_maps (strided DMA) to remove these extra XLA passes over the activation.
    x = jnp.transpose(x_nchw, (0, 2, 3, 1)).astype(jnp.bfloat16)
    x = jnp.pad(x, ((0, 0), (0, 0), (0, 0), (0, c_in_p - c_in)))

    m0 = n * h * w
    tm0, m0p = _m_tiling(m0)
    x_flat = jnp.pad(x.reshape(m0, c_in_p), ((0, m0p - m0), (0, 0)))

    # bn0 batch statistics (applied as a fused prologue inside conv1 / shortcut)
    sum0, sumsq0 = channel_stats(x_flat, tm0)
    mask0 = _pad_vec(jnp.ones((c_in,), jnp.float32), c_in_p)        # rmask=None
    scale0, bias0 = _bn_affine(sum0, sumsq0, float(m0),
                               _pad_vec(params["bn0_gamma"], c_in_p),
                               _pad_vec(params["bn0_beta"], c_in_p), mask0)

    ho = (h - 1) // stride + 1
    wo = (w - 1) // stride + 1
    mo = n * ho * wo
    tmo, mop = _m_tiling(mo)

    w_sc = _prep_w_1x1(params["shortcut_w"], c_in_p, c3p)
    w1 = _prep_w_1x1(params["conv1_w"], c_in_p, c1p)
    w2 = _prep_w_3x3(params["conv2_w"], k2p, c2p)
    w3 = _prep_w_1x1(params["conv3_w"], c2p, c3p)

    prob = None                                   # reuse_prob

    # shortcut: 1x1 stride-s conv of relu(bn0(x)) (bn0 fused in the prologue)
    sc_prob, sc_rmask = gate_prob_mask(params["shortcut_gate"], tau)
    x_s = x[:, ::stride, ::stride, :]
    x_s_flat = jnp.pad(x_s.reshape(mo, c_in_p), ((0, mop - mo), (0, 0)))
    shortcut = fused_conv_matmul(x_s_flat, w_sc, scale0, bias0,
                                 out_dtype=jnp.bfloat16, m_true=mo, tm=tmo)
    sc_flops = conv_flops(prob, sc_prob, c_in, ho, wo, 1)
    rmask = sc_rmask
    prob = sc_prob

    # conv1: 1x1 on relu(bn0(x)); epilogue emits bn1 batch-stat partials
    p1, rmask1 = gate_prob_mask(params["conv1_gate"], tau)
    h1, s1, q1 = fused_conv_matmul(x_flat, w1, scale0, bias0, with_stats=True,
                                   out_dtype=jnp.bfloat16, m_true=m0, tm=tm0)
    f1 = conv_flops(prob, p1, c_in, h, w, 1)
    scale1, bias1 = _bn_affine(s1[:c1], q1[:c1], float(m0),
                               params["bn1_gamma"], params["bn1_beta"], rmask1)

    # conv2: 3x3 stride-s. bn1 + channel mask + ReLU is applied before the spatial
    # zero-pad (so the padded border stays exactly zero); the identity prologue is
    # compiled out of the kernel (with_prologue=False).
    # TODO(synk): fuse bn1+mask+relu into the conv2 prologue (per-tap border masking) once the in-kernel 9-tap variant lands, removing this extra h1 HBM pass.
    p2, rmask2 = gate_prob_mask(params["conv2_gate"], tau)
    h1_act = jnp.maximum(h1[:m0, :c1].astype(jnp.float32) * scale1 + bias1,
                         0.0).astype(jnp.bfloat16)
    patches = _im2col_3x3(h1_act.reshape(n, h, w, c1), stride)      # (n, ho, wo, 9*c1)
    patches = jnp.pad(patches.reshape(mo, 9 * c1),
                      ((0, mop - mo), (0, k2p - 9 * c1)))
    h2, s2, q2 = fused_conv_matmul(patches, w2, with_stats=True,
                                   out_dtype=jnp.bfloat16, m_true=mo, tm=tmo)
    f2 = conv_flops(p1, p2, c1, ho, wo, 3)
    scale2, bias2 = _bn_affine(s2, q2, float(mo),
                               _pad_vec(params["bn2_gamma"], c2p),
                               _pad_vec(params["bn2_beta"], c2p),
                               _pad_vec(rmask2, c2p))

    # conv3: 1x1 on relu(bn2(h2)) (fused prologue), gate reused from the shortcut;
    # epilogue fuses the residual add + weighted_feature(., rmask).
    p3, rmask3 = sc_prob, sc_rmask
    out = fused_conv_matmul(h2, w3, scale2, bias2,
                            residual=shortcut, out_mask=_pad_vec(rmask, c3p),
                            out_dtype=jnp.float32, m_true=mo, tm=tmo)
    f3 = conv_flops(p2, p3, c2, ho, wo, 1)
    prob = p3

    out = out[:mo, :c3].reshape(n, ho, wo, c3)
    out = jnp.transpose(out, (0, 3, 1, 2))                          # back to NCHW

    prob_list = (p1, p2, p3, sc_prob)
    flops_list = (f1, f2, f3, sc_flops)
    return out, rmask3, prob, prob_list, flops_list


# ----------------------------------- main ------------------------------------ #

if __name__ == "__main__":
    key = jax.random.PRNGKey(0)
    k_param, k_x = jax.random.split(key)

    in_planes = 8
    out_planes_list = (8, 8, 16)
    stride = 2

    params = init_params(k_param, in_planes, out_planes_list)
    x = jax.random.normal(k_x, (2, in_planes, 16, 16), jnp.float32)   # NCHW

    out, rmask_3, prob, prob_list, flops_list = bottleneck_gated_forward(
        params, x, tau=1.0, stride=stride, project=True)
    jax.block_until_ready(out)
    jax.block_until_ready(rmask_3)

    assert out.shape == (2, out_planes_list[-1], 16 // stride, 16 // stride)
    assert rmask_3.shape == (out_planes_list[-1],)
    assert len(prob_list) == 4 and len(flops_list) == 4
    assert bool(jnp.all(jnp.isfinite(out)))

    print("KERNEL_OK")
</pallas_src>

<mosaic_0001>
module attributes {stable_mosaic.version = 11 : i64} {
  func.func @_fused_conv_kernel(%arg0: i32, %arg1: i32, %arg2: i32, %arg3: memref<256x128xbf16, #tpu.memory_space<vmem>>, %arg4: memref<128x128xbf16, #tpu.memory_space<vmem>>, %arg5: memref<1x128xf32, #tpu.memory_space<vmem>>, %arg6: memref<1x128xf32, #tpu.memory_space<vmem>>, %arg7: memref<256x128xbf16, #tpu.memory_space<vmem>>, %arg8: memref<8x128xf32, #tpu.memory_space<vmem>>, %arg9: memref<256x128xf32, #tpu.memory_space<vmem>>) attributes {dimension_semantics = [#tpu.dimension_semantics<parallel>, #tpu.dimension_semantics<parallel>, #tpu.dimension_semantics<arbitrary>], iteration_bounds = array<i64: 2, 1, 1>, scalar_prefetch = 0 : i64, scratch_operands = 1 : i64, tpu.core_type = #tpu.core_type<tc>, window_params = [{transform_indices = @transform_0, window_bounds = array<i64: 256, 128>}, {transform_indices = @transform_1, window_bounds = array<i64: 128, 128>}, {transform_indices = @transform_2, window_bounds = array<i64: 1, 128>}, {transform_indices = @transform_3, window_bounds = array<i64: 1, 128>}, {transform_indices = @transform_4, window_bounds = array<i64: 256, 128>}, {transform_indices = @transform_5, window_bounds = array<i64: 8, 128>}]} {
    %c0_i32 = arith.constant 0 : i32
    %0 = arith.cmpi eq, %arg2, %c0_i32 : i32
    %1 = arith.extui %0 : i1 to i32
    %c0_i32_0 = arith.constant 0 : i32
    %2 = arith.cmpi ne, %1, %c0_i32_0 : i32
    scf.if %2 {
      %cst_15 = arith.constant 0.000000e+00 : f32
      %22 = vector.broadcast %cst_15 : f32 to vector<256x128xf32>
      %c0_16 = arith.constant 0 : index
      %c0_17 = arith.constant 0 : index
      %23 = vector.load %arg9[%c0_16, %c0_17] : memref<256x128xf32, #tpu.memory_space<vmem>>, vector<256x128xf32>
      tpu.vector_store %arg9[%c0_16, %c0_17], %22 {strides = array<i32>} : memref<256x128xf32, #tpu.memory_space<vmem>>, vector<256x128xf32>,
    } else {
    }
    %c0 = arith.constant 0 : index
    %c0_1 = arith.constant 0 : index
    %3 = vector.load %arg3[%c0, %c0_1] : memref<256x128xbf16, #tpu.memory_space<vmem>>, vector<256x128xbf16>
    %4 = arith.extf %3 : vector<256x128xbf16> to vector<256x128xf32>
    %c0_2 = arith.constant 0 : index
    %c0_3 = arith.constant 0 : index
    %5 = vector.load %arg5[%c0_2, %c0_3] : memref<1x128xf32, #tpu.memory_space<vmem>>, vector<1x128xf32>
    %6 = vector.broadcast %5 : vector<1x128xf32> to vector<256x128xf32>
    %7 = arith.mulf %4, %6 : vector<256x128xf32>
    %c0_4 = arith.constant 0 : index
    %c0_5 = arith.constant 0 : index
    %8 = vector.load %arg6[%c0_4, %c0_5] : memref<1x128xf32, #tpu.memory_space<vmem>>, vector<1x128xf32>
    %9 = vector.broadcast %8 : vector<1x128xf32> to vector<256x128xf32>
    %10 = arith.addf %7, %9 : vector<256x128xf32>
    %cst = arith.constant 0.000000e+00 : f32
    %11 = vector.broadcast %cst : f32 to vector<256x128xf32>
    %12 = arith.maximumf %10, %11 : vector<256x128xf32>
    %13 = arith.truncf %12 : vector<256x128xf32> to vector<256x128xbf16>
    %c0_6 = arith.constant 0 : index
    %c0_7 = arith.constant 0 : index
    %14 = vector.load %arg9[%c0_6, %c0_7] : memref<256x128xf32, #tpu.memory_space<vmem>>, vector<256x128xf32>
    %c0_8 = arith.constant 0 : index
    %c0_9 = arith.constant 0 : index
    %15 = vector.load %arg4[%c0_8, %c0_9] : memref<128x128xbf16, #tpu.memory_space<vmem>>, vector<128x128xbf16>
    %cst_10 = arith.constant dense<0.000000e+00> : vector<256x128xf32>
    %16 = tpu.matmul %13, %15, %cst_10 {dimension_numbers = #tpu.dot_dimension_numbers<[1], [0], [0], [1], [0, 0, 1, 1], [], []>} : vector<256x128xbf16>, vector<128x128xbf16>, vector<256x128xf32> -> vector<256x128xf32>
    %17 = arith.addf %14, %16 : vector<256x128xf32>
    %c0_11 = arith.constant 0 : index
    %c0_12 = arith.constant 0 : index
    %18 = vector.load %arg9[%c0_11, %c0_12] : memref<256x128xf32, #tpu.memory_space<vmem>>, vector<256x128xf32>
    tpu.vector_store %arg9[%c0_11, %c0_12], %17 {strides = array<i32>} : memref<256x128xf32, #tpu.memory_space<vmem>>, vector<256x128xf32>,
    %c0_i32_13 = arith.constant 0 : i32
    %19 = arith.cmpi eq, %arg2, %c0_i32_13 : i32
    %20 = arith.extui %19 : i1 to i32
    %c0_i32_14 = arith.constant 0 : i32
    %21 = arith.cmpi ne, %20, %c0_i32_14 : i32
    scf.if %21 {
      %c0_15 = arith.constant 0 : index
      %c0_16 = arith.constant 0 : index
      %22 = vector.load %arg9[%c0_15, %c0_16] : memref<256x128xf32, #tpu.memory_space<vmem>>, vector<256x128xf32>
      %c256_i32 = arith.constant 256 : i32
      %23 = arith.muli %arg0, %c256_i32 : i32
      %24 = tpu.iota {dimensions = array<i32: 0>} : vector<256x128xi32>
      %25 = vector.broadcast %23 : i32 to vector<256x128xi32>
      %26 = arith.addi %25, %24 : vector<256x128xi32>
      %c512_i32 = arith.constant 512 : i32
      %27 = vector.broadcast %c512_i32 : i32 to vector<256x128xi32>
      %28 = arith.cmpi slt, %26, %27 : vector<256x128xi32>
      %cst_17 = arith.constant 0.000000e+00 : f32
      %29 = vector.broadcast %cst_17 : f32 to vector<256x128xf32>
      %30 = arith.select %28, %22, %29 : vector<256x128xi1>, vector<256x128xf32>
      %cst_18 = arith.constant dense<0.000000e+00> : vector<128xf32>
      %31 = vector.multi_reduction <add>, %30, %cst_18 [0] : vector<256x128xf32> to vector<128xf32>
      %32 = vector.shape_cast %31 : vector<128xf32> to vector<1x128xf32>
      %33 = arith.mulf %30, %30 : vector<256x128xf32>
      %cst_19 = arith.constant dense<0.000000e+00> : vector<128xf32>
      %34 = vector.multi_reduction <add>, %33, %cst_19 [0] : vector<256x128xf32> to vector<128xf32>
      %35 = vector.shape_cast %34 : vector<128xf32> to vector<1x128xf32>
      %36 = tpu.iota {dimensions = array<i32: 0>} : vector<8x128xi32>
      %c0_i32_20 = arith.constant 0 : i32
      %37 = vector.broadcast %c0_i32_20 : i32 to vector<8x128xi32>
      %38 = arith.cmpi eq, %36, %37 : vector<8x128xi32>
      %cst_21 = arith.constant 0.000000e+00 : f32
      %39 = vector.shape_cast %32 : vector<1x128xf32> to vector<1x128xf32>
      %40 = vector.broadcast %39 : vector<1x128xf32> to vector<8x128xf32>
      %41 = vector.broadcast %cst_21 : f32 to vector<8x128xf32>
      %42 = arith.select %38, %40, %41 : vector<8x128xi1>, vector<8x128xf32>
      %c1_i32 = arith.constant 1 : i32
      %43 = vector.broadcast %c1_i32 : i32 to vector<8x128xi32>
      %44 = arith.cmpi eq, %36, %43 : vector<8x128xi32>
      %cst_22 = arith.constant 0.000000e+00 : f32
      %45 = vector.shape_cast %35 : vector<1x128xf32> to vector<1x128xf32>
      %46 = vector.broadcast %45 : vector<1x128xf32> to vector<8x128xf32>
      %47 = vector.broadcast %cst_22 : f32 to vector<8x128xf32>
      %48 = arith.select %44, %46, %47 : vector<8x128xi1>, vector<8x128xf32>
      %49 = arith.addf %42, %48 : vector<8x128xf32>
      %c0_23 = arith.constant 0 : index
      %c0_24 = arith.constant 0 : index
      %50 = vector.load %arg8[%c0_23, %c0_24] : memref<8x128xf32, #tpu.memory_space<vmem>>, vector<8x128xf32>
      tpu.vector_store %arg8[%c0_23, %c0_24], %49 {strides = array<i32>} : memref<8x128xf32, #tpu.memory_space<vmem>>, vector<8x128xf32>,
      %51 = arith.truncf %22 : vector<256x128xf32> to vector<256x128xbf16>
      %c0_25 = arith.constant 0 : index
      %c0_26 = arith.constant 0 : index
      %52 = vector.load %arg7[%c0_25, %c0_26] : memref<256x128xbf16, #tpu.memory_space<vmem>>, vector<256x128xbf16>
      tpu.vector_store %arg7[%c0_25, %c0_26], %51 {strides = array<i32>} : memref<256x128xbf16, #tpu.memory_space<vmem>>, vector<256x128xbf16>,
    } else {
    }
    return
  }
  func.func @transform_0(%arg0: i32, %arg1: i32, %arg2: i32) -> (i32, i32) {
    %c0_i32 = arith.constant 0 : i32
    return %arg0, %arg2 : i32, i32
  }
  func.func @transform_1(%arg0: i32, %arg1: i32, %arg2: i32) -> (i32, i32) {
    %c0_i32 = arith.constant 0 : i32
    return %arg2, %arg1 : i32, i32
  }
  func.func @transform_2(%arg0: i32, %arg1: i32, %arg2: i32) -> (i32, i32) {
    %c0_i32 = arith.constant 0 : i32
    %c0_i32_0 = arith.constant 0 : i32
    return %c0_i32, %arg2 : i32, i32
  }
  func.func @transform_3(%arg0: i32, %arg1: i32, %arg2: i32) -> (i32, i32) {
    %c0_i32 = arith.constant 0 : i32
    %c0_i32_0 = arith.constant 0 : i32
    return %c0_i32, %arg2 : i32, i32
  }
  func.func @transform_4(%arg0: i32, %arg1: i32, %arg2: i32) -> (i32, i32) {
    %c0_i32 = arith.constant 0 : i32
    return %arg0, %arg1 : i32, i32
  }
  func.func @transform_5(%arg0: i32, %arg1: i32, %arg2: i32) -> (i32, i32) {
    %c0_i32 = arith.constant 0 : i32
    return %arg0, %arg1 : i32, i32
  }
}

module attributes {stable_mosaic.version = 11 : i64} {
  func.func @_channel_stats_kernel(%arg0: i32, %arg1: memref<256x128xbf16, #tpu.memory_space<vmem>>, %arg2: memref<8x128xf32, #tpu.memory_space<vmem>>) attributes {dimension_semantics = [#tpu.dimension_semantics<arbitrary>], iteration_bounds = array<i64: 2>, scalar_prefetch = 0 : i64, scratch_operands = 0 : i64, tpu.core_type = #tpu.core_type<tc>, window_params = [{transform_indices = @transform_0, window_bounds = array<i64: 256, 128>}, {pipeline_mode = #tpu.pipeline_mode<synchronous>, transform_indices = @transform_1, window_bounds = array<i64: 8, 128>}]} {
    %c0 = arith.constant 0 : index
    %c0_0 = arith.constant 0 : index
    %0 = vector.load %arg1[%c0, %c0_0] : memref<256x128xbf16, #tpu.memory_space<vmem>>, vector<256x128xbf16>
    %1 = arith.extf %0 : vector<256x128xbf16> to vector<256x128xf32>
    %cst = arith.constant dense<0.000000e+00> : vector<128xf32>
    %2 = vector.multi_reduction <add>, %1, %cst [0] : vector<256x128xf32> to vector<128xf32>
    %3 = vector.shape_cast %2 : vector<128xf32> to vector<1x128xf32>
    %4 = arith.mulf %1, %1 : vector<256x128xf32>
    %cst_1 = arith.constant dense<0.000000e+00> : vector<128xf32>
    %5 = vector.multi_reduction <add>, %4, %cst_1 [0] : vector<256x128xf32> to vector<128xf32>
    %6 = vector.shape_cast %5 : vector<128xf32> to vector<1x128xf32>
    %7 = tpu.iota {dimensions = array<i32: 0>} : vector<8x128xi32>
    %c0_i32 = arith.constant 0 : i32
    %8 = vector.broadcast %c0_i32 : i32 to vector<8x128xi32>
    %9 = arith.cmpi eq, %7, %8 : vector<8x128xi32>
    %cst_2 = arith.constant 0.000000e+00 : f32
    %10 = vector.shape_cast %3 : vector<1x128xf32> to vector<1x128xf32>
    %11 = vector.broadcast %10 : vector<1x128xf32> to vector<8x128xf32>
    %12 = vector.broadcast %cst_2 : f32 to vector<8x128xf32>
    %13 = arith.select %9, %11, %12 : vector<8x128xi1>, vector<8x128xf32>
    %c1_i32 = arith.constant 1 : i32
    %14 = vector.broadcast %c1_i32 : i32 to vector<8x128xi32>
    %15 = arith.cmpi eq, %7, %14 : vector<8x128xi32>
    %cst_3 = arith.constant 0.000000e+00 : f32
    %16 = vector.shape_cast %6 : vector<1x128xf32> to vector<1x128xf32>
    %17 = vector.broadcast %16 : vector<1x128xf32> to vector<8x128xf32>
    %18 = vector.broadcast %cst_3 : f32 to vector<8x128xf32>
    %19 = arith.select %15, %17, %18 : vector<8x128xi1>, vector<8x128xf32>
    %20 = arith.addf %13, %19 : vector<8x128xf32>
    %c0_i32_4 = arith.constant 0 : i32
    %21 = arith.cmpi eq, %arg0, %c0_i32_4 : i32
    %22 = arith.extui %21 : i1 to i32
    %c0_i32_5 = arith.constant 0 : i32
    %23 = arith.cmpi ne, %22, %c0_i32_5 : i32
    scf.if %23 {
      %c0_8 = arith.constant 0 : index
      %c0_9 = arith.constant 0 : index
      %27 = vector.load %arg2[%c0_8, %c0_9] : memref<8x128xf32, #tpu.memory_space<vmem>>, vector<8x128xf32>
      tpu.vector_store %arg2[%c0_8, %c0_9], %20 {strides = array<i32>} : memref<8x128xf32, #tpu.memory_space<vmem>>, vector<8x128xf32>,
    } else {
    }
    %c0_i32_6 = arith.constant 0 : i32
    %24 = arith.cmpi ne, %arg0, %c0_i32_6 : i32
    %25 = arith.extui %24 : i1 to i32
    %c0_i32_7 = arith.constant 0 : i32
    %26 = arith.cmpi ne, %25, %c0_i32_7 : i32
    scf.if %26 {
      %c0_8 = arith.constant 0 : index
      %c0_9 = arith.constant 0 : index
      %27 = vector.load %arg2[%c0_8, %c0_9] : memref<8x128xf32, #tpu.memory_space<vmem>>, vector<8x128xf32>
      %28 = arith.addf %27, %20 : vector<8x128xf32>
      %c0_10 = arith.constant 0 : index
      %c0_11 = arith.constant 0 : index
      %29 = vector.load %arg2[%c0_10, %c0_11] : memref<8x128xf32, #tpu.memory_space<vmem>>, vector<8x128xf32>
      tpu.vector_store %arg2[%c0_10, %c0_11], %28 {strides = array<i32>} : memref<8x128xf32, #tpu.memory_space<vmem>>, vector<8x128xf32>,
    } else {
    }
    return
  }
  func.func @transform_0(%arg0: i32) -> (i32, i32) {
    %c0_i32 = arith.constant 0 : i32
    %c0_i32_0 = arith.constant 0 : i32
    return %arg0, %c0_i32 : i32, i32
  }
  func.func @transform_1(%arg0: i32) -> (i32, i32) {
    %c0_i32 = arith.constant 0 : i32
    %c0_i32_0 = arith.constant 0 : i32
    %c0_i32_1 = arith.constant 0 : i32
    return %c0_i32, %c0_i32_0 : i32, i32
  }
}

module attributes {stable_mosaic.version = 11 : i64} {
  func.func @_fused_conv_kernel(%arg0: i32, %arg1: i32, %arg2: i32, %arg3: memref<64x128xbf16, #tpu.memory_space<vmem>>, %arg4: memref<128x128xbf16, #tpu.memory_space<vmem>>, %arg5: memref<64x128xbf16, #tpu.memory_space<vmem>>, %arg6: memref<8x128xf32, #tpu.memory_space<vmem>>, %arg7: memref<64x128xf32, #tpu.memory_space<vmem>>) attributes {dimension_semantics = [#tpu.dimension_semantics<parallel>, #tpu.dimension_semantics<parallel>, #tpu.dimension_semantics<arbitrary>], iteration_bounds = array<i64: 2, 1, 1>, scalar_prefetch = 0 : i64, scratch_operands = 1 : i64, tpu.core_type = #tpu.core_type<tc>, window_params = [{transform_indices = @transform_0, window_bounds = array<i64: 64, 128>}, {transform_indices = @transform_1, window_bounds = array<i64: 128, 128>}, {transform_indices = @transform_2, window_bounds = array<i64: 64, 128>}, {transform_indices = @transform_3, window_bounds = array<i64: 8, 128>}]} {
    %c0_i32 = arith.constant 0 : i32
    %0 = arith.cmpi eq, %arg2, %c0_i32 : i32
    %1 = arith.extui %0 : i1 to i32
    %c0_i32_0 = arith.constant 0 : i32
    %2 = arith.cmpi ne, %1, %c0_i32_0 : i32
    scf.if %2 {
      %cst_10 = arith.constant 0.000000e+00 : f32
      %12 = vector.broadcast %cst_10 : f32 to vector<64x128xf32>
      %c0_11 = arith.constant 0 : index
      %c0_12 = arith.constant 0 : index
      %13 = vector.load %arg7[%c0_11, %c0_12] : memref<64x128xf32, #tpu.memory_space<vmem>>, vector<64x128xf32>
      tpu.vector_store %arg7[%c0_11, %c0_12], %12 {strides = array<i32>} : memref<64x128xf32, #tpu.memory_space<vmem>>, vector<64x128xf32>,
    } else {
    }
    %c0 = arith.constant 0 : index
    %c0_1 = arith.constant 0 : index
    %3 = vector.load %arg3[%c0, %c0_1] : memref<64x128xbf16, #tpu.memory_space<vmem>>, vector<64x128xbf16>
    %c0_2 = arith.constant 0 : index
    %c0_3 = arith.constant 0 : index
    %4 = vector.load %arg7[%c0_2, %c0_3] : memref<64x128xf32, #tpu.memory_space<vmem>>, vector<64x128xf32>
    %c0_4 = arith.constant 0 : index
    %c0_5 = arith.constant 0 : index
    %5 = vector.load %arg4[%c0_4, %c0_5] : memref<128x128xbf16, #tpu.memory_space<vmem>>, vector<128x128xbf16>
    %cst = arith.constant dense<0.000000e+00> : vector<64x128xf32>
    %6 = tpu.matmul %3, %5, %cst {dimension_numbers = #tpu.dot_dimension_numbers<[1], [0], [0], [1], [0, 0, 1, 1], [], []>} : vector<64x128xbf16>, vector<128x128xbf16>, vector<64x128xf32> -> vector<64x128xf32>
    %7 = arith.addf %4, %6 : vector<64x128xf32>
    %c0_6 = arith.constant 0 : index
    %c0_7 = arith.constant 0 : index
    %8 = vector.load %arg7[%c0_6, %c0_7] : memref<64x128xf32, #tpu.memory_space<vmem>>, vector<64x128xf32>
    tpu.vector_store %arg7[%c0_6, %c0_7], %7 {strides = array<i32>} : memref<64x128xf32, #tpu.memory_space<vmem>>, vector<64x128xf32>,
    %c0_i32_8 = arith.constant 0 : i32
    %9 = arith.cmpi eq, %arg2, %c0_i32_8 : i32
    %10 = arith.extui %9 : i1 to i32
    %c0_i32_9 = arith.constant 0 : i32
    %11 = arith.cmpi ne, %10, %c0_i32_9 : i32
    scf.if %11 {
      %c0_10 = arith.constant 0 : index
      %c0_11 = arith.constant 0 : index
      %12 = vector.load %arg7[%c0_10, %c0_11] : memref<64x128xf32, #tpu.memory_space<vmem>>, vector<64x128xf32>
      %c64_i32 = arith.constant 64 : i32
      %13 = arith.muli %arg0, %c64_i32 : i32
      %14 = tpu.iota {dimensions = array<i32: 0>} : vector<64x128xi32>
      %15 = vector.broadcast %13 : i32 to vector<64x128xi32>
      %16 = arith.addi %15, %14 : vector<64x128xi32>
      %c128_i32 = arith.constant 128 : i32
      %17 = vector.broadcast %c128_i32 : i32 to vector<64x128xi32>
      %18 = arith.cmpi slt, %16, %17 : vector<64x128xi32>
      %cst_12 = arith.constant 0.000000e+00 : f32
      %19 = vector.broadcast %cst_12 : f32 to vector<64x128xf32>
      %20 = arith.select %18, %12, %19 : vector<64x128xi1>, vector<64x128xf32>
      %cst_13 = arith.constant dense<0.000000e+00> : vector<128xf32>
      %21 = vector.multi_reduction <add>, %20, %cst_13 [0] : vector<64x128xf32> to vector<128xf32>
      %22 = vector.shape_cast %21 : vector<128xf32> to vector<1x128xf32>
      %23 = arith.mulf %20, %20 : vector<64x128xf32>
      %cst_14 = arith.constant dense<0.000000e+00> : vector<128xf32>
      %24 = vector.multi_reduction <add>, %23, %cst_14 [0] : vector<64x128xf32> to vector<128xf32>
      %25 = vector.shape_cast %24 : vector<128xf32> to vector<1x128xf32>
      %26 = tpu.iota {dimensions = array<i32: 0>} : vector<8x128xi32>
      %c0_i32_15 = arith.constant 0 : i32
      %27 = vector.broadcast %c0_i32_15 : i32 to vector<8x128xi32>
      %28 = arith.cmpi eq, %26, %27 : vector<8x128xi32>
      %cst_16 = arith.constant 0.000000e+00 : f32
      %29 = vector.shape_cast %22 : vector<1x128xf32> to vector<1x128xf32>
      %30 = vector.broadcast %29 : vector<1x128xf32> to vector<8x128xf32>
      %31 = vector.broadcast %cst_16 : f32 to vector<8x128xf32>
      %32 = arith.select %28, %30, %31 : vector<8x128xi1>, vector<8x128xf32>
      %c1_i32 = arith.constant 1 : i32
      %33 = vector.broadcast %c1_i32 : i32 to vector<8x128xi32>
      %34 = arith.cmpi eq, %26, %33 : vector<8x128xi32>
      %cst_17 = arith.constant 0.000000e+00 : f32
      %35 = vector.shape_cast %25 : vector<1x128xf32> to vector<1x128xf32>
      %36 = vector.broadcast %35 : vector<1x128xf32> to vector<8x128xf32>
      %37 = vector.broadcast %cst_17 : f32 to vector<8x128xf32>
      %38 = arith.select %34, %36, %37 : vector<8x128xi1>, vector<8x128xf32>
      %39 = arith.addf %32, %38 : vector<8x128xf32>
      %c0_18 = arith.constant 0 : index
      %c0_19 = arith.constant 0 : index
      %40 = vector.load %arg6[%c0_18, %c0_19] : memref<8x128xf32, #tpu.memory_space<vmem>>, vector<8x128xf32>
      tpu.vector_store %arg6[%c0_18, %c0_19], %39 {strides = array<i32>} : memref<8x128xf32, #tpu.memory_space<vmem>>, vector<8x128xf32>,
      %41 = arith.truncf %12 : vector<64x128xf32> to vector<64x128xbf16>
      %c0_20 = arith.constant 0 : index
      %c0_21 = arith.constant 0 : index
      %42 = vector.load %arg5[%c0_20, %c0_21] : memref<64x128xbf16, #tpu.memory_space<vmem>>, vector<64x128xbf16>
      tpu.vector_store %arg5[%c0_20, %c0_21], %41 {strides = array<i32>} : memref<64x128xbf16, #tpu.memory_space<vmem>>, vector<64x128xbf16>,
    } else {
    }
    return
  }
  func.func @transform_0(%arg0: i32, %arg1: i32, %arg2: i32) -> (i32, i32) {
    %c0_i32 = arith.constant 0 : i32
    return %arg0, %arg2 : i32, i32
  }
  func.func @transform_1(%arg0: i32, %arg1: i32, %arg2: i32) -> (i32, i32) {
    %c0_i32 = arith.constant 0 : i32
    return %arg2, %arg1 : i32, i32
  }
  func.func @transform_2(%arg0: i32, %arg1: i32, %arg2: i32) -> (i32, i32) {
    %c0_i32 = arith.constant 0 : i32
    return %arg0, %arg1 : i32, i32
  }
  func.func @transform_3(%arg0: i32, %arg1: i32, %arg2: i32) -> (i32, i32) {
    %c0_i32 = arith.constant 0 : i32
    return %arg0, %arg1 : i32, i32
  }
}

module attributes {stable_mosaic.version = 11 : i64} {
  func.func @_fused_conv_kernel(%arg0: i32, %arg1: i32, %arg2: i32, %arg3: memref<64x128xbf16, #tpu.memory_space<vmem>>, %arg4: memref<128x128xbf16, #tpu.memory_space<vmem>>, %arg5: memref<1x128xf32, #tpu.memory_space<vmem>>, %arg6: memref<1x128xf32, #tpu.memory_space<vmem>>, %arg7: memref<64x128xbf16, #tpu.memory_space<vmem>>, %arg8: memref<64x128xf32, #tpu.memory_space<vmem>>) attributes {dimension_semantics = [#tpu.dimension_semantics<parallel>, #tpu.dimension_semantics<parallel>, #tpu.dimension_semantics<arbitrary>], iteration_bounds = array<i64: 2, 1, 1>, scalar_prefetch = 0 : i64, scratch_operands = 1 : i64, tpu.core_type = #tpu.core_type<tc>, window_params = [{transform_indices = @transform_0, window_bounds = array<i64: 64, 128>}, {transform_indices = @transform_1, window_bounds = array<i64: 128, 128>}, {transform_indices = @transform_2, window_bounds = array<i64: 1, 128>}, {transform_indices = @transform_3, window_bounds = array<i64: 1, 128>}, {transform_indices = @transform_4, window_bounds = array<i64: 64, 128>}]} {
    %c0_i32 = arith.constant 0 : i32
    %0 = arith.cmpi eq, %arg2, %c0_i32 : i32
    %1 = arith.extui %0 : i1 to i32
    %c0_i32_0 = arith.constant 0 : i32
    %2 = arith.cmpi ne, %1, %c0_i32_0 : i32
    scf.if %2 {
      %cst_15 = arith.constant 0.000000e+00 : f32
      %22 = vector.broadcast %cst_15 : f32 to vector<64x128xf32>
      %c0_16 = arith.constant 0 : index
      %c0_17 = arith.constant 0 : index
      %23 = vector.load %arg8[%c0_16, %c0_17] : memref<64x128xf32, #tpu.memory_space<vmem>>, vector<64x128xf32>
      tpu.vector_store %arg8[%c0_16, %c0_17], %22 {strides = array<i32>} : memref<64x128xf32, #tpu.memory_space<vmem>>, vector<64x128xf32>,
    } else {
    }
    %c0 = arith.constant 0 : index
    %c0_1 = arith.constant 0 : index
    %3 = vector.load %arg3[%c0, %c0_1] : memref<64x128xbf16, #tpu.memory_space<vmem>>, vector<64x128xbf16>
    %4 = arith.extf %3 : vector<64x128xbf16> to vector<64x128xf32>
    %c0_2 = arith.constant 0 : index
    %c0_3 = arith.constant 0 : index
    %5 = vector.load %arg5[%c0_2, %c0_3] : memref<1x128xf32, #tpu.memory_space<vmem>>, vector<1x128xf32>
    %6 = vector.broadcast %5 : vector<1x128xf32> to vector<64x128xf32>
    %7 = arith.mulf %4, %6 : vector<64x128xf32>
    %c0_4 = arith.constant 0 : index
    %c0_5 = arith.constant 0 : index
    %8 = vector.load %arg6[%c0_4, %c0_5] : memref<1x128xf32, #tpu.memory_space<vmem>>, vector<1x128xf32>
    %9 = vector.broadcast %8 : vector<1x128xf32> to vector<64x128xf32>
    %10 = arith.addf %7, %9 : vector<64x128xf32>
    %cst = arith.constant 0.000000e+00 : f32
    %11 = vector.broadcast %cst : f32 to vector<64x128xf32>
    %12 = arith.maximumf %10, %11 : vector<64x128xf32>
    %13 = arith.truncf %12 : vector<64x128xf32> to vector<64x128xbf16>
    %c0_6 = arith.constant 0 : index
    %c0_7 = arith.constant 0 : index
    %14 = vector.load %arg8[%c0_6, %c0_7] : memref<64x128xf32, #tpu.memory_space<vmem>>, vector<64x128xf32>
    %c0_8 = arith.constant 0 : index
    %c0_9 = arith.constant 0 : index
    %15 = vector.load %arg4[%c0_8, %c0_9] : memref<128x128xbf16, #tpu.memory_space<vmem>>, vector<128x128xbf16>
    %cst_10 = arith.constant dense<0.000000e+00> : vector<64x128xf32>
    %16 = tpu.matmul %13, %15, %cst_10 {dimension_numbers = #tpu.dot_dimension_numbers<[1], [0], [0], [1], [0, 0, 1, 1], [], []>} : vector<64x128xbf16>, vector<128x128xbf16>, vector<64x128xf32> -> vector<64x128xf32>
    %17 = arith.addf %14, %16 : vector<64x128xf32>
    %c0_11 = arith.constant 0 : index
    %c0_12 = arith.constant 0 : index
    %18 = vector.load %arg8[%c0_11, %c0_12] : memref<64x128xf32, #tpu.memory_space<vmem>>, vector<64x128xf32>
    tpu.vector_store %arg8[%c0_11, %c0_12], %17 {strides = array<i32>} : memref<64x128xf32, #tpu.memory_space<vmem>>, vector<64x128xf32>,
    %c0_i32_13 = arith.constant 0 : i32
    %19 = arith.cmpi eq, %arg2, %c0_i32_13 : i32
    %20 = arith.extui %19 : i1 to i32
    %c0_i32_14 = arith.constant 0 : i32
    %21 = arith.cmpi ne, %20, %c0_i32_14 : i32
    scf.if %21 {
      %c0_15 = arith.constant 0 : index
      %c0_16 = arith.constant 0 : index
      %22 = vector.load %arg8[%c0_15, %c0_16] : memref<64x128xf32, #tpu.memory_space<vmem>>, vector<64x128xf32>
      %23 = arith.truncf %22 : vector<64x128xf32> to vector<64x128xbf16>
      %c0_17 = arith.constant 0 : index
      %c0_18 = arith.constant 0 : index
      %24 = vector.load %arg7[%c0_17, %c0_18] : memref<64x128xbf16, #tpu.memory_space<vmem>>, vector<64x128xbf16>
      tpu.vector_store %arg7[%c0_17, %c0_18], %23 {strides = array<i32>} : memref<64x128xbf16, #tpu.memory_space<vmem>>, vector<64x128xbf16>,
    } else {
    }
    return
  }
  func.func @transform_0(%arg0: i32, %arg1: i32, %arg2: i32) -> (i32, i32) {
    %c0_i32 = arith.constant 0 : i32
    return %arg0, %arg2 : i32, i32
  }
  func.func @transform_1(%arg0: i32, %arg1: i32, %arg2: i32) -> (i32, i32) {
    %c0_i32 = arith.constant 0 : i32
    return %arg2, %arg1 : i32, i32
  }
  func.func @transform_2(%arg0: i32, %arg1: i32, %arg2: i32) -> (i32, i32) {
    %c0_i32 = arith.constant 0 : i32
    %c0_i32_0 = arith.constant 0 : i32
    return %c0_i32, %arg2 : i32, i32
  }
  func.func @transform_3(%arg0: i32, %arg1: i32, %arg2: i32) -> (i32, i32) {
    %c0_i32 = arith.constant 0 : i32
    %c0_i32_0 = arith.constant 0 : i32
    return %c0_i32, %arg2 : i32, i32
  }
  func.func @transform_4(%arg0: i32, %arg1: i32, %arg2: i32) -> (i32, i32) {
    %c0_i32 = arith.constant 0 : i32
    return %arg0, %arg1 : i32, i32
  }
}

module attributes {stable_mosaic.version = 11 : i64} {
  func.func @_fused_conv_kernel(%arg0: i32, %arg1: i32, %arg2: i32, %arg3: memref<64x128xbf16, #tpu.memory_space<vmem>>, %arg4: memref<128x128xbf16, #tpu.memory_space<vmem>>, %arg5: memref<1x128xf32, #tpu.memory_space<vmem>>, %arg6: memref<1x128xf32, #tpu.memory_space<vmem>>, %arg7: memref<64x128xbf16, #tpu.memory_space<vmem>>, %arg8: memref<1x128xf32, #tpu.memory_space<vmem>>, %arg9: memref<64x128xf32, #tpu.memory_space<vmem>>, %arg10: memref<64x128xf32, #tpu.memory_space<vmem>>) attributes {dimension_semantics = [#tpu.dimension_semantics<parallel>, #tpu.dimension_semantics<parallel>, #tpu.dimension_semantics<arbitrary>], iteration_bounds = array<i64: 2, 1, 1>, scalar_prefetch = 0 : i64, scratch_operands = 1 : i64, tpu.core_type = #tpu.core_type<tc>, window_params = [{transform_indices = @transform_0, window_bounds = array<i64: 64, 128>}, {transform_indices = @transform_1, window_bounds = array<i64: 128, 128>}, {transform_indices = @transform_2, window_bounds = array<i64: 1, 128>}, {transform_indices = @transform_3, window_bounds = array<i64: 1, 128>}, {transform_indices = @transform_4, window_bounds = array<i64: 64, 128>}, {transform_indices = @transform_5, window_bounds = array<i64: 1, 128>}, {transform_indices = @transform_6, window_bounds = array<i64: 64, 128>}]} {
    %c0_i32 = arith.constant 0 : i32
    %0 = arith.cmpi eq, %arg2, %c0_i32 : i32
    %1 = arith.extui %0 : i1 to i32
    %c0_i32_0 = arith.constant 0 : i32
    %2 = arith.cmpi ne, %1, %c0_i32_0 : i32
    scf.if %2 {
      %cst_15 = arith.constant 0.000000e+00 : f32
      %22 = vector.broadcast %cst_15 : f32 to vector<64x128xf32>
      %c0_16 = arith.constant 0 : index
      %c0_17 = arith.constant 0 : index
      %23 = vector.load %arg10[%c0_16, %c0_17] : memref<64x128xf32, #tpu.memory_space<vmem>>, vector<64x128xf32>
      tpu.vector_store %arg10[%c0_16, %c0_17], %22 {strides = array<i32>} : memref<64x128xf32, #tpu.memory_space<vmem>>, vector<64x128xf32>,
    } else {
    }
    %c0 = arith.constant 0 : index
    %c0_1 = arith.constant 0 : index
    %3 = vector.load %arg3[%c0, %c0_1] : memref<64x128xbf16, #tpu.memory_space<vmem>>, vector<64x128xbf16>
    %4 = arith.extf %3 : vector<64x128xbf16> to vector<64x128xf32>
    %c0_2 = arith.constant 0 : index
    %c0_3 = arith.constant 0 : index
    %5 = vector.load %arg5[%c0_2, %c0_3] : memref<1x128xf32, #tpu.memory_space<vmem>>, vector<1x128xf32>
    %6 = vector.broadcast %5 : vector<1x128xf32> to vector<64x128xf32>
    %7 = arith.mulf %4, %6 : vector<64x128xf32>
    %c0_4 = arith.constant 0 : index
    %c0_5 = arith.constant 0 : index
    %8 = vector.load %arg6[%c0_4, %c0_5] : memref<1x128xf32, #tpu.memory_space<vmem>>, vector<1x128xf32>
    %9 = vector.broadcast %8 : vector<1x128xf32> to vector<64x128xf32>
    %10 = arith.addf %7, %9 : vector<64x128xf32>
    %cst = arith.constant 0.000000e+00 : f32
    %11 = vector.broadcast %cst : f32 to vector<64x128xf32>
    %12 = arith.maximumf %10, %11 : vector<64x128xf32>
    %13 = arith.truncf %12 : vector<64x128xf32> to vector<64x128xbf16>
    %c0_6 = arith.constant 0 : index
    %c0_7 = arith.constant 0 : index
    %14 = vector.load %arg10[%c0_6, %c0_7] : memref<64x128xf32, #tpu.memory_space<vmem>>, vector<64x128xf32>
    %c0_8 = arith.constant 0 : index
    %c0_9 = arith.constant 0 : index
    %15 = vector.load %arg4[%c0_8, %c0_9] : memref<128x128xbf16, #tpu.memory_space<vmem>>, vector<128x128xbf16>
    %cst_10 = arith.constant dense<0.000000e+00> : vector<64x128xf32>
    %16 = tpu.matmul %13, %15, %cst_10 {dimension_numbers = #tpu.dot_dimension_numbers<[1], [0], [0], [1], [0, 0, 1, 1], [], []>} : vector<64x128xbf16>, vector<128x128xbf16>, vector<64x128xf32> -> vector<64x128xf32>
    %17 = arith.addf %14, %16 : vector<64x128xf32>
    %c0_11 = arith.constant 0 : index
    %c0_12 = arith.constant 0 : index
    %18 = vector.load %arg10[%c0_11, %c0_12] : memref<64x128xf32, #tpu.memory_space<vmem>>, vector<64x128xf32>
    tpu.vector_store %arg10[%c0_11, %c0_12], %17 {strides = array<i32>} : memref<64x128xf32, #tpu.memory_space<vmem>>, vector<64x128xf32>,
    %c0_i32_13 = arith.constant 0 : i32
    %19 = arith.cmpi eq, %arg2, %c0_i32_13 : i32
    %20 = arith.extui %19 : i1 to i32
    %c0_i32_14 = arith.constant 0 : i32
    %21 = arith.cmpi ne, %20, %c0_i32_14 : i32
    scf.if %21 {
      %c0_15 = arith.constant 0 : index
      %c0_16 = arith.constant 0 : index
      %22 = vector.load %arg10[%c0_15, %c0_16] : memref<64x128xf32, #tpu.memory_space<vmem>>, vector<64x128xf32>
      %c0_17 = arith.constant 0 : index
      %c0_18 = arith.constant 0 : index
      %23 = vector.load %arg7[%c0_17, %c0_18] : memref<64x128xbf16, #tpu.memory_space<vmem>>, vector<64x128xbf16>
      %24 = arith.extf %23 : vector<64x128xbf16> to vector<64x128xf32>
      %25 = arith.addf %22, %24 : vector<64x128xf32>
      %c0_19 = arith.constant 0 : index
      %c0_20 = arith.constant 0 : index
      %26 = vector.load %arg8[%c0_19, %c0_20] : memref<1x128xf32, #tpu.memory_space<vmem>>, vector<1x128xf32>
      %27 = vector.broadcast %26 : vector<1x128xf32> to vector<64x128xf32>
      %28 = arith.mulf %25, %27 : vector<64x128xf32>
      %c0_21 = arith.constant 0 : index
      %c0_22 = arith.constant 0 : index
      %29 = vector.load %arg9[%c0_21, %c0_22] : memref<64x128xf32, #tpu.memory_space<vmem>>, vector<64x128xf32>
      tpu.vector_store %arg9[%c0_21, %c0_22], %28 {strides = array<i32>} : memref<64x128xf32, #tpu.memory_space<vmem>>, vector<64x128xf32>,
    } else {
    }
    return
  }
  func.func @transform_0(%arg0: i32, %arg1: i32, %arg2: i32) -> (i32, i32) {
    %c0_i32 = arith.constant 0 : i32
    return %arg0, %arg2 : i32, i32
  }
  func.func @transform_1(%arg0: i32, %arg1: i32, %arg2: i32) -> (i32, i32) {
    %c0_i32 = arith.constant 0 : i32
    return %arg2, %arg1 : i32, i32
  }
  func.func @transform_2(%arg0: i32, %arg1: i32, %arg2: i32) -> (i32, i32) {
    %c0_i32 = arith.constant 0 : i32
    %c0_i32_0 = arith.constant 0 : i32
    return %c0_i32, %arg2 : i32, i32
  }
  func.func @transform_3(%arg0: i32, %arg1: i32, %arg2: i32) -> (i32, i32) {
    %c0_i32 = arith.constant 0 : i32
    %c0_i32_0 = arith.constant 0 : i32
    return %c0_i32, %arg2 : i32, i32
  }
  func.func @transform_4(%arg0: i32, %arg1: i32, %arg2: i32) -> (i32, i32) {
    %c0_i32 = arith.constant 0 : i32
    return %arg0, %arg1 : i32, i32
  }
  func.func @transform_5(%arg0: i32, %arg1: i32, %arg2: i32) -> (i32, i32) {
    %c0_i32 = arith.constant 0 : i32
    %c0_i32_0 = arith.constant 0 : i32
    return %c0_i32, %arg1 : i32, i32
  }
  func.func @transform_6(%arg0: i32, %arg1: i32, %arg2: i32) -> (i32, i32) {
    %c0_i32 = arith.constant 0 : i32
    return %arg0, %arg1 : i32, i32
  }
}

</mosaic_0001>

<bundles_post_ra>
// kernel: reverse
= control target key start
LH: loop header
LB: loop body
LE: loop exit
PB: predicated region body
PF: predicated region fallthrough
CT: control target
= control target key end

     0   :  { %v2_v0 = vlaneseq  ;;  %s127_s0 = inlined_call_operand.vmem [shape: f32[8], index: 0, kind: input, shape index: {}]   ;;  %s128_s1 = inlined_call_operand.vmem [shape: f32[8], index: 1, kind: output, shape index: {}]  }
   0x2   :  { %v3_v1 = vsub.s32 7, %v2_v0 }
   0x4   :  { %4 = vset.pattern.permute.xlu0 %v3_v1 }
   0x5   :  { %v45_v2 = vld [vmem:[#allocation1] sm:$0x1]  ;;  %v22_v3 = vld [vmem:[%s127_s0] sm:$0x1]  ;;  %v60_v10 = vshrl.u32 %v2_v0, 7 }
   0x6   :  { %46 = vst [vmem:[#allocation0] sm:$0x1] %v45_v2 }
   0x7   :  { %23 = vst [vmem:[#allocation1 + $0x1] sm:$0x1] %v22_v3  ;;  %vm61_vm0 = vcmp.lt.s32.totalorder %v60_v10, 1 }
   0xd   :  { %v48_v4 = vld [vmem:[#allocation0 + $0x7] ss:$-1 sm:$0xff] }
   0xe   :  { %v49_v5 = vrot.slane %v48_v4, 7  ;;  %v42_v6 = vld [vmem:[#allocation1 + $0x1] sm:$0x1] }
   0xf   :  { %44 = vst [vmem:[#allocation0 + $0x8] sm:$0x1] %v42_v6 }
  0x10   :  { %50 = vperm.xlu0 %4, %v49_v5  }
  0x16   :  { %v55_v7 = vld [vmem:[#allocation0 + $0xf] ss:$-1 sm:$0xff] }
  0x17   :  { %v56_v8 = vrot.slane %v55_v7, 7 }
  0x19   :  { %57 = vperm.xlu0 %4, %v56_v8  }
  0x82   :  { %v51_v9 = vpop.permute.xlu0 %50 }
  0x83   :  { %52 = vst [vmem:[#allocation2] sm:$0xff] %v51_v9 }
  0x8b   :  { %v58_v11 = vpop.permute.xlu0 %57 }
  0x8c   :  { %62 = vst.msk [vmem:[#allocation2] sm:$0xff] %vm61_vm0, %v58_v11 }
  0x93   :  { %v65_v12 = vld [vmem:[#allocation2] sm:$0x1] }
  0x94   :  { %68 = vst [vmem:[#allocation3] sm:$0x1] %v65_v12 }
  0x9b   :  { %v85_v13 = vld [vmem:[#allocation3] sm:$0x1] }
  0x9c   :  { %86 = vst [vmem:[%s128_s1] sm:$0x1] %v85_v13 }

// kernel: bottleneck_gated_forward.5
= control target key start
LH: loop header
LB: loop body
LE: loop exit
PB: predicated region body
PF: predicated region fallthrough
CT: control target
= control target key end

     0   :  { %s436_s6 = smov 0   ;;  %s482_s0 = inlined_call_operand.vmem [shape: bf16[512,128], index: 0, kind: input, shape index: {}]   ;;  %s483_s1 = inlined_call_operand.vmem [shape: f32[8,128], index: 1, kind: output, shape index: {}]  }
   0x1 LB: > { %s442_s7 = sadd.s32 4294967295, %s424_s6   ;;  %p324_p0 = scmp.ge.s32.totalorder %s424_s6, 1  ;;  %s424_s6 = sphi %s436_s6, %s11_s6  }
   0x2   : > { %p83_p1 = scmp.lt.s32.totalorder %s424_s6, 3 }
   0x4   : > { %p84_p2 = pnand %p324_p0, %p83_p1 }
   0x5   : > { %s325_s8 = sshll.u32 (!%p84_p2), %s442_s7, 5  ;;  %p327_p4 = scmp.ne.s32.totalorder (!%p84_p2), %s442_s7, 0 }
   0x6   : > { %87 = sbr.rel (%p84_p2) target bundleno = 108 (0x6c), region = 24  ;;  %p99_p3 = scmp.lt.s32.totalorder (!%p84_p2), %s325_s8, 63 }
   0xb   : > { %s485_s8 = smov (!%p99_p3, %s325_s8), 63 }
   0xc   : > { %s326_s9 = sshll.u32 %s485_s8, 2 }
   0xd   : > { %s450_s12 = scalar_lea.vmem %s482_s0, %s326_s9 }
   0xe   : > { %v332_v0 = vld [vmem:[%s450_s12] sm:$0xff]   ;;  %v395_v1 = vld [vmem:[%s450_s12 + $0x8] sm:$0xff]   ;;  %v396_v5 = vld [vmem:[%s450_s12 + $0x10] sm:$0xff]  }
   0xf   : > { %v333_v2 = vunpack.c.l.bf16 %v332_v0  ;;  %v334_v3 = vunpack.c.h.bf16 %v332_v0  ;;  %v337_v4 = vunpack.c.l.bf16 %v395_v1  ;;  %v338_v7 = vunpack.c.h.bf16 %v395_v1  ;;  %v397_v13 = vld [vmem:[%s450_s12 + $0x18] sm:$0xff]   ;;  %v398_v22 = vld [vmem:[%s450_s12 + $0x20] sm:$0xff]   ;;  %v399_v31 = vld [vmem:[%s450_s12 + $0x28] sm:$0xff]  }
  0x10   : > { %v341_v11 = vunpack.c.l.bf16 %v396_v5  ;;  %v342_v15 = vunpack.c.h.bf16 %v396_v5  ;;  %v345_v19 = vunpack.c.l.bf16 %v397_v13  ;;  %v346_v24 = vunpack.c.h.bf16 %v397_v13  ;;  %v400_v40 = vld [vmem:[%s450_s12 + $0x30] sm:$0xff]   ;;  %v401_v49 = vld [vmem:[%s450_s12 + $0x38] sm:$0xff]   ;;  %v402_v58 = vld [vmem:[%s450_s12 + $0x40] sm:$0xff]  }
  0x11   : > { %v168_v6 = vadd.f32 %v334_v3, %v333_v2  ;;  %v205_v8 = vmul.f32 %v333_v2, %v333_v2  ;;  %v206_v9 = vmul.f32 %v334_v3, %v334_v3  ;;  %v207_v12 = vmul.f32 %v337_v4, %v337_v4  ;;  %v403_v3 = vld [vmem:[%s450_s12 + $0x48] sm:$0xff]  }
  0x12   : > { %v208_v16 = vmul.f32 %v338_v7, %v338_v7  ;;  %v209_v20 = vmul.f32 %v341_v11, %v341_v11  ;;  %v210_v25 = vmul.f32 %v342_v15, %v342_v15  ;;  %v349_v28 = vunpack.c.l.bf16 %v398_v22 }
  0x13   : > { %v169_v10 = vadd.f32 %v337_v4, %v168_v6  ;;  %v237_v17 = vadd.f32 %v206_v9, %v205_v8  ;;  %v211_v29 = vmul.f32 %v345_v19, %v345_v19  ;;  %v350_v33 = vunpack.c.h.bf16 %v398_v22 }
  0x14   : > { %v212_v34 = vmul.f32 %v346_v24, %v346_v24  ;;  %v353_v37 = vunpack.c.l.bf16 %v399_v31  ;;  %v213_v38 = vmul.f32 %v349_v28, %v349_v28  ;;  %v354_v42 = vunpack.c.h.bf16 %v399_v31 }
  0x15   : > { %v170_v14 = vadd.f32 %v338_v7, %v169_v10  ;;  %v238_v21 = vadd.f32 %v237_v17, %v207_v12  ;;  %v214_v43 = vmul.f32 %v350_v33, %v350_v33  ;;  %v357_v46 = vunpack.c.l.bf16 %v400_v40  ;;  %v404_v12 = vld [vmem:[%s450_s12 + $0x50] sm:$0xff]  }
  0x16   : > { %v215_v47 = vmul.f32 %v353_v37, %v353_v37  ;;  %v358_v51 = vunpack.c.h.bf16 %v400_v40  ;;  %v216_v52 = vmul.f32 %v354_v42, %v354_v42  ;;  %v361_v55 = vunpack.c.l.bf16 %v401_v49 }
  0x17   : > { %v171_v18 = vadd.f32 %v341_v11, %v170_v14  ;;  %v239_v26 = vadd.f32 %v238_v21, %v208_v16  ;;  %v217_v56 = vmul.f32 %v357_v46, %v357_v46  ;;  %v362_v60 = vunpack.c.h.bf16 %v401_v49  ;;  %v405_v21 = vld [vmem:[%s450_s12 + $0x58] sm:$0xff]  }
  0x18   : > { %v218_v61 = vmul.f32 %v358_v51, %v358_v51  ;;  %v365_v0 = vunpack.c.l.bf16 %v402_v58  ;;  %v219_v1 = vmul.f32 %v361_v55, %v361_v55  ;;  %v366_v5 = vunpack.c.h.bf16 %v402_v58 }
  0x19   : > { %v172_v23 = vadd.f32 %v342_v15, %v171_v18  ;;  %v240_v30 = vadd.f32 %v239_v26, %v209_v20  ;;  %v220_v6 = vmul.f32 %v362_v60, %v362_v60  ;;  %v369_v9 = vunpack.c.l.bf16 %v403_v3 }
  0x1a   : > { %v221_v10 = vmul.f32 %v365_v0, %v365_v0  ;;  %v370_v14 = vunpack.c.h.bf16 %v403_v3  ;;  %v222_v15 = vmul.f32 %v366_v5, %v366_v5  ;;  %v373_v18 = vunpack.c.l.bf16 %v404_v12 }
  0x1b   : > { %v173_v27 = vadd.f32 %v345_v19, %v172_v23  ;;  %v241_v35 = vadd.f32 %v240_v30, %v210_v25  ;;  %v223_v19 = vmul.f32 %v369_v9, %v369_v9  ;;  %v374_v23 = vunpack.c.h.bf16 %v404_v12  ;;  %v406_v30 = vld [vmem:[%s450_s12 + $0x60] sm:$0xff]  }
  0x1d   : > { %v174_v32 = vadd.f32 %v346_v24, %v173_v27  ;;  %v242_v39 = vadd.f32 %v241_v35, %v211_v29  ;;  %v224_v24 = vmul.f32 %v370_v14, %v370_v14  ;;  %v377_v27 = vunpack.c.l.bf16 %v405_v21 }
  0x1f   : > { %v175_v36 = vadd.f32 %v349_v28, %v174_v32  ;;  %v243_v44 = vadd.f32 %v242_v39, %v212_v34  ;;  %v225_v28 = vmul.f32 %v373_v18, %v373_v18  ;;  %v378_v32 = vunpack.c.h.bf16 %v405_v21  ;;  %v407_v39 = vld [vmem:[%s450_s12 + $0x68] sm:$0xff]  }
  0x21   : > { %v176_v41 = vadd.f32 %v350_v33, %v175_v36  ;;  %v244_v48 = vadd.f32 %v243_v44, %v213_v38  ;;  %v226_v33 = vmul.f32 %v374_v23, %v374_v23  ;;  %v381_v36 = vunpack.c.l.bf16 %v406_v30 }
  0x23   : > { %v177_v45 = vadd.f32 %v353_v37, %v176_v41  ;;  %v245_v53 = vadd.f32 %v244_v48, %v214_v43  ;;  %v227_v37 = vmul.f32 %v377_v27, %v377_v27  ;;  %v382_v41 = vunpack.c.h.bf16 %v406_v30  ;;  %v408_v48 = vld [vmem:[%s450_s12 + $0x70] sm:$0xff]  }
  0x25   : > { %v178_v50 = vadd.f32 %v354_v42, %v177_v45  ;;  %v246_v57 = vadd.f32 %v245_v53, %v215_v47  ;;  %v228_v42 = vmul.f32 %v378_v32, %v378_v32  ;;  %v385_v45 = vunpack.c.l.bf16 %v407_v39 }
  0x27   : > { %v179_v54 = vadd.f32 %v357_v46, %v178_v50  ;;  %v247_v62 = vadd.f32 %v246_v57, %v216_v52  ;;  %v229_v46 = vmul.f32 %v381_v36, %v381_v36  ;;  %v386_v50 = vunpack.c.h.bf16 %v407_v39  ;;  %v409_v57 = vld [vmem:[%s450_s12 + $0x78] sm:$0xff]  }
  0x28   : > { %v394_v3 = vunpack.c.h.bf16 %v409_v57 }
  0x29   : > { %v180_v59 = vadd.f32 %v358_v51, %v179_v54  ;;  %v248_v2 = vadd.f32 %v247_v62, %v217_v56  ;;  %v230_v51 = vmul.f32 %v382_v41, %v382_v41  ;;  %v389_v54 = vunpack.c.l.bf16 %v408_v48 }
  0x2b   : > { %v181_v63 = vadd.f32 %v361_v55, %v180_v59  ;;  %v249_v7 = vadd.f32 %v248_v2, %v218_v61  ;;  %v231_v55 = vmul.f32 %v385_v45, %v385_v45  ;;  %v390_v59 = vunpack.c.h.bf16 %v408_v48 }
  0x2d   : > { %v182_v4 = vadd.f32 %v362_v60, %v181_v63  ;;  %v250_v11 = vadd.f32 %v249_v7, %v219_v1  ;;  %v232_v60 = vmul.f32 %v386_v50, %v386_v50  ;;  %v393_v63 = vunpack.c.l.bf16 %v409_v57 }
  0x2f   : > { %v183_v8 = vadd.f32 %v365_v0, %v182_v4  ;;  %v251_v16 = vadd.f32 %v250_v11, %v220_v6  ;;  %v233_v0 = vmul.f32 %v389_v54, %v389_v54  ;;  %v234_v4 = vmul.f32 %v390_v59, %v390_v59 }
  0x30   : > { %v235_v7 = vmul.f32 %v393_v63, %v393_v63 }
  0x31   : > { %v184_v13 = vadd.f32 %v366_v5, %v183_v8  ;;  %v252_v20 = vadd.f32 %v251_v16, %v221_v10  ;;  %v236_v10 = vmul.f32 %v394_v3, %v394_v3 }
  0x33   : > { %v185_v17 = vadd.f32 %v369_v9, %v184_v13  ;;  %v253_v25 = vadd.f32 %v252_v20, %v222_v15 }
  0x35   : > { %v186_v22 = vadd.f32 %v370_v14, %v185_v17  ;;  %v254_v29 = vadd.f32 %v253_v25, %v223_v19  ;;  %v274_v17 = vlaneseq }
  0x37   : > { %v187_v26 = vadd.f32 %v373_v18, %v186_v22  ;;  %v255_v34 = vadd.f32 %v254_v29, %v224_v24  ;;  %v275_v22 = vshrl.u32 %v274_v17, 7 }
  0x39   : > { %v188_v31 = vadd.f32 %v374_v23, %v187_v26  ;;  %v256_v38 = vadd.f32 %v255_v34, %v225_v28  ;;  %vm276_vm0 = vcmp.eq.s32.totalorder %v275_v22, 0  ;;  %vm278_vm1 = vcmp.eq.s32.totalorder %v275_v22, 1 }
  0x3b   : > { %v189_v35 = vadd.f32 %v377_v27, %v188_v31  ;;  %v257_v43 = vadd.f32 %v256_v38, %v226_v33 }
  0x3d   : > { %v190_v40 = vadd.f32 %v378_v32, %v189_v35  ;;  %v258_v47 = vadd.f32 %v257_v43, %v227_v37 }
  0x3f   : > { %v191_v44 = vadd.f32 %v381_v36, %v190_v40  ;;  %v259_v52 = vadd.f32 %v258_v47, %v228_v42 }
  0x41   : > { %v192_v49 = vadd.f32 %v382_v41, %v191_v44  ;;  %v260_v56 = vadd.f32 %v259_v52, %v229_v46 }
  0x43   : > { %v193_v53 = vadd.f32 %v385_v45, %v192_v49  ;;  %v261_v61 = vadd.f32 %v260_v56, %v230_v51 }
  0x45   : > { %v194_v58 = vadd.f32 %v386_v50, %v193_v53  ;;  %v262_v1 = vadd.f32 %v261_v61, %v231_v55 }
  0x47   : > { %v195_v62 = vadd.f32 %v389_v54, %v194_v58  ;;  %v263_v5 = vadd.f32 %v262_v1, %v232_v60 }
  0x49   : > { %v196_v2 = vadd.f32 %v390_v59, %v195_v62  ;;  %v264_v8 = vadd.f32 %v263_v5, %v233_v0 }
  0x4b   : > { %v197_v6 = vadd.f32 %v393_v63, %v196_v2  ;;  %v265_v11 = vadd.f32 %v264_v8, %v234_v4 }
  0x4d   : > { %v198_v9 = vadd.f32 %v394_v3, %v197_v6  ;;  %v266_v13 = vadd.f32 %v265_v11, %v235_v7 }
  0x4f   : > { %v199_v12 = vrot.slane %v198_v9, 4  ;;  %v267_v15 = vadd.f32 %v266_v13, %v236_v10 }
  0x51   : > { %v200_v14 = vadd.f32 %v199_v12, %v198_v9  ;;  %v268_v18 = vrot.slane %v267_v15, 4 }
  0x53   : > { %v201_v16 = vrot.slane %v200_v14, 2  ;;  %v269_v20 = vadd.f32 %v268_v18, %v267_v15 }
  0x55   : > { %v202_v19 = vadd.f32 %v201_v16, %v200_v14  ;;  %v270_v23 = vrot.slane %v269_v20, 2 }
  0x57   : > { %v203_v21 = vrot.slane %v202_v19, 1  ;;  %v271_v25 = vadd.f32 %v270_v23, %v269_v20 }
  0x59   : > { %v204_v24 = vadd.f32 %v203_v21, %v202_v19  ;;  %v272_v26 = vrot.slane %v271_v25, 1 }
  0x5a   : > { %284 = sbr.rel (%p327_p4) target bundleno = 97 (0x61), region = 28 }
  0x5b   : > { %v273_v27 = vadd.f32 %v272_v26, %v271_v25  ;;  %v277_v28 = vsel %vm276_vm0, %v204_v24, 0.0 }
  0x5d   : > { %v279_v29 = vsel %vm278_vm1, %v273_v27, 0.0 }
  0x5e   : > { %v280_v30 = vadd.f32 %v279_v29, %v277_v28 }
  0x60   : > { %285 = vst [vmem:[%s483_s1] sm:$0xff] %v280_v30 }
  0x61 PF: > { %p328_p5 = scmp.eq.s32.totalorder %s442_s7, 0 }
  0x63   : > { %289 = sbr.rel (%p328_p5) target bundleno = 108 (0x6c), region = 32 }
  0x68   : > { %v290_v31 = vld [vmem:[%s483_s1] sm:$0xff] }
  0x69   : > { %v291_v32 = vadd.f32 %v290_v31, %v280_v30 }
  0x6b   : > { %292 = vst [vmem:[%s483_s1] sm:$0xff] %v291_v32 }
  0x6c PF: > { %s11_s6 = sadd.s32 1, %s424_s6  }
  0x6d   : > { %p8_p6 = scmp.ge.s32.totalorder %s11_s6, 4  }
  0x6f   :  { %10 = sbr.rel (!%p8_p6) target bundleno = 1 (0x1), region = 58 }

// kernel: bottleneck_gated_forward.7
= control target key start
LH: loop header
LB: loop body
LE: loop exit
PB: predicated region body
PF: predicated region fallthrough
CT: control target
= control target key end

     0   :  { %s1655_s18 = smov 0   ;;  %s1657_s19 = smov 0   ;;  %s2004_s0 = inlined_call_operand.vmem [shape: bf16[512,128], index: 0, kind: input, shape index: {}]   ;;  %s2005_s1 = inlined_call_operand.vmem [shape: bf16[128,128], index: 1, kind: input, shape index: {}]   ;;  %s2006_s2 = inlined_call_operand.vmem [shape: f32[1,128], index: 2, kind: input, shape index: {}]   ;;  %s2007_s3 = inlined_call_operand.vmem [shape: f32[1,128], index: 3, kind: input, shape index: {}]   ;;  %s2008_s4 = inlined_call_operand.vmem [shape: bf16[512,128], index: 4, kind: output, shape index: {0}]   ;;  %s2009_s5 = inlined_call_operand.vmem [shape: f32[16,128], index: 5, kind: output, shape index: {1}]  }
   0x1   :  { %s1659_s20 = smov 0  }
   0x2 LB: > { %s35_s21 = sadd.s32 1, %s1619_s19  ;;  %p1328_p0 = scmp.ge.s32.totalorder %s1623_s20, 1  ;;  %s1623_s20 = sphi %s1659_s20, %s16_s20   ;;  %s1619_s19 = sphi %s1657_s19, %s2011_s19   ;;  %s1615_s18 = sphi %s1655_s18, %s2010_s18  }
   0x3   : > { %p37_p1 = scmp.ge.s32.totalorder %s35_s21, 2  ;;  %p251_p2 = scmp.lt.s32.totalorder %s1623_s20, 3 }
   0x5   : > { %s2013_s21 = smov (%p37_p1, %s35_s21), 0  ;;  %p252_p3 = pnand %p1328_p0, %p251_p2 }
   0x6   : > { %s1329_s24 = sshll.u32 (!%p252_p3), %s1615_s18, 5  ;;  %p339_p5 = scmp.lt.s32.totalorder (!%p252_p3), %s1615_s18, 1 }
   0x7   : > { %255 = sbr.rel (%p252_p3) target bundleno = 295 (0x127), region = 36  ;;  %p307_p4 = scmp.lt.s32.totalorder (!%p252_p3), %s1329_s24, 63 }
   0xc   : > { %v1376_v0 = vld [vmem:[%s2005_s1 + $0x38] sm:$0xff]  ;;  %v1375_v1 = vld [vmem:[%s2005_s1 + $0x30] sm:$0xff]  ;;  %s2015_s24 = smov (!%p307_p4, %s1329_s24), 63  ;;  %v1374_v2 = vld [vmem:[%s2005_s1 + $0x28] sm:$0xff] }
   0xd   : > { %662 = vmatpush.bf16.msra.mxu0 %v1376_v0  ;;  %1551 = vmatpush.bf16.msra.mxu1 %v1376_v0  ;;  %s1330_s27 = sshll.u32 %s2015_s24, 2  ;;  %v1373_v4 = vld [vmem:[%s2005_s1 + $0x20] sm:$0xff]  ;;  %v1372_v12 = vld [vmem:[%s2005_s1 + $0x18] sm:$0xff]  ;;  %v1371_v20 = vld [vmem:[%s2005_s1 + $0x10] sm:$0xff]  ;;  %s1366_s24 = sshll.u32 %s1615_s18, 8 }
   0xe   : > { %1552 = vmatpush.bf16.msra.mxu2 %v1376_v0  ;;  %1553 = vmatpush.bf16.msra.mxu3 %v1376_v0  ;;  %s1693_s7 = scalar_lea.vmem %s2004_s0, %s1330_s27  ;;  %v1704_v9 = vld [vmem:[%s2006_s2] ss:$0 sm:$0xff]  ;;  %v1370_v27 = vld [vmem:[%s2005_s1 + $0x8] sm:$0xff]  ;;  %s1809_s30 = scalar_lea.vmem %s2008_s4, %s1330_s27 }
   0xf   : > { %v1378_v3 = vld [vmem:[%s1693_s7] sm:$0xff]   ;;  %v1521_v32 = vld [vmem:[%s1693_s7 + $0x8] sm:$0xff]   ;;  %s2017_s18 = smov (!%p339_p5, %s1615_s18), 1 }
  0x10   : > { %v1524_v5 = vld [vmem:[%s1693_s7 + $0x20] sm:$0xff]   ;;  %v1379_v7 = vunpack.c.l.bf16 %v1378_v3  ;;  %v1380_v8 = vunpack.c.h.bf16 %v1378_v3  ;;  %v1525_v36 = vld [vmem:[%s1693_s7 + $0x28] sm:$0xff]   ;;  %v1383_v42 = vunpack.c.l.bf16 %v1521_v32  ;;  %v1384_v45 = vunpack.c.h.bf16 %v1521_v32  ;;  %s1333_s27 = sshll.u32 %s2017_s18, 3 }
  0x11   : > { %663 = vmatpush.bf16.msra.mxu0 %v1375_v1  ;;  %1554 = vmatpush.bf16.msra.mxu1 %v1375_v1  ;;  %v1528_v6 = vld [vmem:[%s1693_s7 + $0x40] sm:$0xff]   ;;  %v1395_v10 = vunpack.c.l.bf16 %v1524_v5  ;;  %v1396_v11 = vunpack.c.h.bf16 %v1524_v5  ;;  %v1529_v43 = vld [vmem:[%s1693_s7 + $0x48] sm:$0xff]   ;;  %v1399_v46 = vunpack.c.l.bf16 %v1525_v36  ;;  %v1400_v47 = vunpack.c.h.bf16 %v1525_v36  ;;  %s345_s8 = scalar_lea.vmem %s2009_s5, %s1333_s27 }
  0x12   : > { %1555 = vmatpush.bf16.msra.mxu2 %v1375_v1  ;;  %1556 = vmatpush.bf16.msra.mxu3 %v1375_v1  ;;  %v1411_v13 = vunpack.c.l.bf16 %v1528_v6  ;;  %v1412_v14 = vunpack.c.h.bf16 %v1528_v6  ;;  %v450_v15 = vmul.f32 %v1704_v9, %v1379_v7  ;;  %v451_v16 = vmul.f32 %v1704_v9, %v1380_v8  ;;  %v1714_v17 = vld [vmem:[%s2007_s3] ss:$0 sm:$0xff] }
  0x13   : > { %v458_v18 = vmul.f32 %v1704_v9, %v1395_v10  ;;  %v459_v19 = vmul.f32 %v1704_v9, %v1396_v11  ;;  %v1532_v33 = vld [vmem:[%s1693_s7 + $0x60] sm:$0xff]   ;;  %v1415_v53 = vunpack.c.l.bf16 %v1529_v43  ;;  %v1416_v54 = vunpack.c.h.bf16 %v1529_v43  ;;  %v1534_v43 = vld [vmem:[%s1693_s7 + $0x70] sm:$0xff]  }
  0x14   : > { %v466_v21 = vmul.f32 %v1704_v9, %v1411_v13  ;;  %v467_v22 = vmul.f32 %v1704_v9, %v1412_v14  ;;  %v486_v23 = vadd.f32 %v1714_v17, %v450_v15  ;;  %v487_v24 = vadd.f32 %v1714_v17, %v451_v16  ;;  %v1369_v39 = vld [vmem:[%s2005_s1] sm:$0xff]  ;;  %v1522_v13 = vld [vmem:[%s1693_s7 + $0x10] sm:$0xff]  }
  0x15   : > { %664 = vmatpush.bf16.msra.mxu0 %v1374_v2  ;;  %1557 = vmatpush.bf16.msra.mxu1 %v1374_v2  ;;  %v494_v25 = vadd.f32 %v1714_v17, %v458_v18  ;;  %v495_v26 = vadd.f32 %v1714_v17, %v459_v19  ;;  %v1427_v37 = vunpack.c.l.bf16 %v1532_v33  ;;  %v1428_v38 = vunpack.c.h.bf16 %v1532_v33  ;;  %v1526_v19 = vld [vmem:[%s1693_s7 + $0x30] sm:$0xff]  }
  0x16   : > { %1558 = vmatpush.bf16.msra.mxu2 %v1374_v2  ;;  %1559 = vmatpush.bf16.msra.mxu3 %v1374_v2  ;;  %v502_v28 = vadd.f32 %v1714_v17, %v466_v21  ;;  %v503_v29 = vadd.f32 %v1714_v17, %v467_v22  ;;  %v518_v30 = vmax.f32 %v486_v23, 0.0  ;;  %v519_v31 = vmax.f32 %v487_v24, 0.0 }
  0x17   : > { %v526_v34 = vmax.f32 %v494_v25, 0.0  ;;  %v527_v35 = vmax.f32 %v495_v26, 0.0  ;;  %v474_v44 = vmul.f32 %v1704_v9, %v1427_v37  ;;  %v475_v48 = vmul.f32 %v1704_v9, %v1428_v38 }
  0x18   : > { %v534_v40 = vmax.f32 %v502_v28, 0.0  ;;  %v535_v41 = vmax.f32 %v503_v29, 0.0  ;;  %v550_v49 = vpack.c.bf16 %v519_v31, %v518_v30  ;;  %v452_v56 = vmul.f32 %v1704_v9, %v1383_v42 }
  0x19   : > { %665 = vmatpush.bf16.msra.mxu0 %v1373_v4  ;;  %1560 = vmatpush.bf16.msra.mxu1 %v1373_v4  ;;  %v554_v50 = vpack.c.bf16 %v527_v35, %v526_v34  ;;  %v510_v51 = vadd.f32 %v1714_v17, %v474_v44  ;;  %v511_v55 = vadd.f32 %v1714_v17, %v475_v48  ;;  %v1387_v25 = vunpack.c.l.bf16 %v1522_v13 }
  0x1a   : > { %1561 = vmatpush.bf16.msra.mxu2 %v1373_v4  ;;  %1562 = vmatpush.bf16.msra.mxu3 %v1373_v4  ;;  %v558_v52 = vpack.c.bf16 %v535_v41, %v534_v40  ;;  %v453_v58 = vmul.f32 %v1704_v9, %v1384_v45  ;;  %v460_v59 = vmul.f32 %v1704_v9, %v1399_v46  ;;  %v1388_v26 = vunpack.c.h.bf16 %v1522_v13 }
  0x1b   : > { %v542_v57 = vmax.f32 %v510_v51, 0.0  ;;  %v461_v60 = vmul.f32 %v1704_v9, %v1400_v47  ;;  %v543_v61 = vmax.f32 %v511_v55, 0.0  ;;  %v468_v62 = vmul.f32 %v1704_v9, %v1415_v53 }
  0x1c   : > { %v469_v63 = vmul.f32 %v1704_v9, %v1416_v54  ;;  %v488_v1 = vadd.f32 %v1714_v17, %v452_v56  ;;  %v489_v2 = vadd.f32 %v1714_v17, %v453_v58  ;;  %v496_v3 = vadd.f32 %v1714_v17, %v460_v59 }
  0x1d   : > { %666 = vmatpush.bf16.msra.mxu0 %v1372_v12  ;;  %1563 = vmatpush.bf16.msra.mxu1 %v1372_v12  ;;  %v562_v0 = vpack.c.bf16 %v543_v61, %v542_v57  ;;  %v497_v4 = vadd.f32 %v1714_v17, %v461_v60  ;;  %v504_v5 = vadd.f32 %v1714_v17, %v468_v62  ;;  %v1404_v28 = vunpack.c.h.bf16 %v1526_v19  ;;  %v1523_v60 = vld [vmem:[%s1693_s7 + $0x18] sm:$0xff]  }
  0x1e   : > { %1564 = vmatpush.bf16.msra.mxu2 %v1372_v12  ;;  %1565 = vmatpush.bf16.msra.mxu3 %v1372_v12  ;;  %v505_v6 = vadd.f32 %v1714_v17, %v469_v63  ;;  %v520_v7 = vmax.f32 %v488_v1, 0.0  ;;  %v521_v8 = vmax.f32 %v489_v2, 0.0  ;;  %v528_v10 = vmax.f32 %v496_v3, 0.0  ;;  %v1533_v12 = vld [vmem:[%s1693_s7 + $0x68] sm:$0xff]   ;;  %v1527_v63 = vld [vmem:[%s1693_s7 + $0x38] sm:$0xff]  }
  0x1f   : > { %v529_v11 = vmax.f32 %v497_v4, 0.0  ;;  %v1431_v14 = vunpack.c.l.bf16 %v1533_v12  ;;  %v1432_v15 = vunpack.c.h.bf16 %v1533_v12  ;;  %v536_v16 = vmax.f32 %v504_v5, 0.0 }
  0x20   : > { %v537_v18 = vmax.f32 %v505_v6, 0.0  ;;  %v551_v23 = vpack.c.bf16 %v521_v8, %v520_v7  ;;  %v454_v36 = vmul.f32 %v1704_v9, %v1387_v25  ;;  %v455_v37 = vmul.f32 %v1704_v9, %v1388_v26 }
  0x21   : > { %667 = vmatpush.bf16.msra.mxu0 %v1371_v20  ;;  %1566 = vmatpush.bf16.msra.mxu1 %v1371_v20  ;;  %v476_v21 = vmul.f32 %v1704_v9, %v1431_v14  ;;  %v477_v22 = vmul.f32 %v1704_v9, %v1432_v15  ;;  %v555_v24 = vpack.c.bf16 %v529_v11, %v528_v10  ;;  %v1435_v44 = vunpack.c.l.bf16 %v1534_v43  ;;  %v1535_v10 = vld [vmem:[%s1693_s7 + $0x78] sm:$0xff]  }
  0x22   : > { %1567 = vmatpush.bf16.msra.mxu2 %v1371_v20  ;;  %1568 = vmatpush.bf16.msra.mxu3 %v1371_v20  ;;  %v1530_v20 = vld [vmem:[%s1693_s7 + $0x50] sm:$0xff]   ;;  %v559_v31 = vpack.c.bf16 %v537_v18, %v536_v16  ;;  %v1436_v45 = vunpack.c.h.bf16 %v1534_v43  ;;  %v490_v46 = vadd.f32 %v1714_v17, %v454_v36  ;;  %v491_v47 = vadd.f32 %v1714_v17, %v455_v37 }
  0x23   : > { %v512_v29 = vadd.f32 %v1714_v17, %v476_v21  ;;  %v513_v30 = vadd.f32 %v1714_v17, %v477_v22  ;;  %v1419_v32 = vunpack.c.l.bf16 %v1530_v20  ;;  %v1420_v33 = vunpack.c.h.bf16 %v1530_v20 }
  0x24   : > { %v479_v51 = vmul.f32 %v1704_v9, %v1436_v45  ;;  %v522_v54 = vmax.f32 %v490_v46, 0.0  ;;  %v523_v55 = vmax.f32 %v491_v47, 0.0  ;;  %v1391_v2 = vunpack.c.l.bf16 %v1523_v60 }
  0x25   : > { %668 = vmatpush.bf16.msra.mxu0 %v1370_v27  ;;  %1569 = vmatpush.bf16.msra.mxu1 %v1370_v27  ;;  %v544_v34 = vmax.f32 %v512_v29, 0.0  ;;  %v545_v35 = vmax.f32 %v513_v30, 0.0  ;;  %v470_v41 = vmul.f32 %v1704_v9, %v1419_v32  ;;  %v471_v42 = vmul.f32 %v1704_v9, %v1420_v33 }
  0x26   : > { %1570 = vmatpush.bf16.msra.mxu2 %v1370_v27  ;;  %1571 = vmatpush.bf16.msra.mxu3 %v1370_v27  ;;  %v1403_v27 = vunpack.c.l.bf16 %v1526_v19  ;;  %v515_v57 = vadd.f32 %v1714_v17, %v479_v51  ;;  %v552_v1 = vpack.c.bf16 %v523_v55, %v522_v54  ;;  %v1392_v6 = vunpack.c.h.bf16 %v1523_v60 }
  0x27   : > { %v563_v40 = vpack.c.bf16 %v545_v35, %v544_v34  ;;  %v507_v53 = vadd.f32 %v1714_v17, %v471_v42  ;;  %v1407_v7 = vunpack.c.l.bf16 %v1527_v63  ;;  %v1408_v8 = vunpack.c.h.bf16 %v1527_v63 }
  0x28   : > { %v462_v38 = vmul.f32 %v1704_v9, %v1403_v27  ;;  %v547_v4 = vmax.f32 %v515_v57, 0.0  ;;  %v456_v14 = vmul.f32 %v1704_v9, %v1391_v2  ;;  %v1439_v16 = vunpack.c.l.bf16 %v1535_v10 }
  0x29   : > { %669 = vmatpush.bf16.msra.mxu0 %v1369_v39  ;;  %1572 = vmatpush.bf16.msra.mxu1 %v1369_v39  ;;  %v539_v62 = vmax.f32 %v507_v53, 0.0  ;;  %v1440_v18 = vunpack.c.h.bf16 %v1535_v10  ;;  %v457_v19 = vmul.f32 %v1704_v9, %v1392_v6  ;;  %v464_v20 = vmul.f32 %v1704_v9, %v1407_v7 }
  0x2a   : > { %1573 = vmatpush.bf16.msra.mxu2 %v1369_v39  ;;  %1574 = vmatpush.bf16.msra.mxu3 %v1369_v39  ;;  %v463_v39 = vmul.f32 %v1704_v9, %v1404_v28  ;;  %v498_v48 = vadd.f32 %v1714_v17, %v462_v38  ;;  %v465_v21 = vmul.f32 %v1704_v9, %v1408_v8 }
  0x2b   : > { %v481_v25 = vmul.f32 %v1704_v9, %v1440_v18  ;;  %v492_v26 = vadd.f32 %v1714_v17, %v456_v14  ;;  %v493_v27 = vadd.f32 %v1714_v17, %v457_v19  ;;  %v500_v28 = vadd.f32 %v1714_v17, %v464_v20 }
  0x2c   : > { %670 = vmatmul.bf16.vlgmr.msra.gmra.mxu0 %v550_v49  ;;  %690 = vmatmul.bf16.vlgmr.msra.gmra.mxu1 %v554_v50  ;;  %v499_v49 = vadd.f32 %v1714_v17, %v463_v39  ;;  %v478_v50 = vmul.f32 %v1704_v9, %v1435_v44  ;;  %v530_v58 = vmax.f32 %v498_v48, 0.0  ;;  %v501_v29 = vadd.f32 %v1714_v17, %v465_v21 }
  0x2d   : > { %710 = vmatmul.bf16.vlgmr.msra.gmra.mxu2 %v558_v52  ;;  %730 = vmatmul.bf16.vlgmr.msra.gmra.mxu3 %v562_v0  ;;  %v506_v52 = vadd.f32 %v1714_v17, %v470_v41  ;;  %v1531_v0 = vld [vmem:[%s1693_s7 + $0x58] sm:$0xff]   ;;  %v517_v33 = vadd.f32 %v1714_v17, %v481_v25  ;;  %v524_v34 = vmax.f32 %v492_v26, 0.0  ;;  %v525_v35 = vmax.f32 %v493_v27, 0.0 }
  0x2e   : > { %v514_v56 = vadd.f32 %v1714_v17, %v478_v50  ;;  %v531_v59 = vmax.f32 %v499_v49, 0.0  ;;  %v1423_v12 = vunpack.c.l.bf16 %v1531_v0  ;;  %v1424_v13 = vunpack.c.h.bf16 %v1531_v0 }
  0x2f   : > { %v538_v61 = vmax.f32 %v506_v52, 0.0  ;;  %v532_v36 = vmax.f32 %v500_v28, 0.0  ;;  %v553_v41 = vpack.c.bf16 %v525_v35, %v524_v34 }
  0x30   : > { %v546_v3 = vmax.f32 %v514_v56, 0.0  ;;  %v556_v5 = vpack.c.bf16 %v531_v59, %v530_v58  ;;  %v472_v22 = vmul.f32 %v1704_v9, %v1423_v12  ;;  %v851_v58 = vlaneseq }
  0x31   : > { %v560_v11 = vpack.c.bf16 %v539_v62, %v538_v61 }
  0x32   : > { %v564_v15 = vpack.c.bf16 %v547_v4, %v546_v3  ;;  %v508_v30 = vadd.f32 %v1714_v17, %v472_v22  ;;  %v1847_v4 = vstv %s1366_s24 }
  0x34   : > { %v540_v37 = vmax.f32 %v508_v30, 0.0 }
  0x3c   : > { %675 = vmatmul.bf16.gmra.mxu0 %v551_v23  ;;  %695 = vmatmul.bf16.gmra.mxu1 %v555_v24  ;;  %v473_v23 = vmul.f32 %v1704_v9, %v1424_v13  ;;  %v480_v24 = vmul.f32 %v1704_v9, %v1439_v16  ;;  %v533_v9 = vmax.f32 %v501_v29, 0.0 }
  0x3d   : > { %715 = vmatmul.bf16.gmra.mxu2 %v559_v31  ;;  %735 = vmatmul.bf16.gmra.mxu3 %v563_v40  ;;  %v549_v40 = vmax.f32 %v517_v33, 0.0 }
  0x3e   : > { %v509_v31 = vadd.f32 %v1714_v17, %v473_v23  ;;  %v516_v32 = vadd.f32 %v1714_v17, %v480_v24  ;;  %v557_v42 = vpack.c.bf16 %v533_v9, %v532_v36 }
  0x40   : > { %v541_v38 = vmax.f32 %v509_v31, 0.0  ;;  %v548_v39 = vmax.f32 %v516_v32, 0.0 }
  0x42   : > { %v561_v43 = vpack.c.bf16 %v541_v38, %v540_v37  ;;  %v565_v44 = vpack.c.bf16 %v549_v40, %v548_v39 }
  0x4c   : > { %680 = vmatmul.bf16.gmra.mxu0 %v552_v1  ;;  %700 = vmatmul.bf16.gmra.mxu1 %v556_v5  ;;  %v1839_v1 = vshrl.u32 %v851_v58, 7 }
  0x4d   : > { %720 = vmatmul.bf16.gmra.mxu2 %v560_v11  ;;  %740 = vmatmul.bf16.gmra.mxu3 %v564_v15 }
  0x4e   : > { %v853_v2 = vadd.s32 8, %v1839_v1  ;;  %v854_v5 = vadd.s32 16, %v1839_v1  ;;  %v855_v12 = vadd.s32 24, %v1839_v1  ;;  %v885_v13 = vadd.s32 %v1847_v4, %v1839_v1 }
  0x4f   : > { %v856_v15 = vadd.s32 32, %v1839_v1  ;;  %v857_v19 = vadd.s32 40, %v1839_v1  ;;  %v858_v24 = vadd.s32 48, %v1839_v1  ;;  %v860_v35 = vadd.s32 64, %v1839_v1 }
  0x50   : > { %v886_v10 = vadd.s32 %v1847_v4, %v853_v2  ;;  %v887_v14 = vadd.s32 %v1847_v4, %v854_v5  ;;  %v888_v18 = vadd.s32 %v1847_v4, %v855_v12  ;;  %vm917_vm1 = vcmp.lt.s32.totalorder %v885_v13, 512 }
  0x51   : > { %v889_v22 = vadd.s32 %v1847_v4, %v856_v15  ;;  %v890_v30 = vadd.s32 %v1847_v4, %v857_v19  ;;  %v891_v33 = vadd.s32 %v1847_v4, %v858_v24  ;;  %v861_v36 = vadd.s32 72, %v1839_v1 }
  0x52   : > { %vm918_vm0 = vcmp.lt.s32.totalorder %v886_v10, 512  ;;  %vm919_vm2 = vcmp.lt.s32.totalorder %v887_v14, 512  ;;  %vm920_vm3 = vcmp.lt.s32.totalorder %v888_v18, 512  ;;  %v859_v39 = vadd.s32 56, %v1839_v1 }
  0x53   : > { %vm921_vm4 = vcmp.lt.s32.totalorder %v889_v22, 512  ;;  %vm922_vm5 = vcmp.lt.s32.totalorder %v890_v30, 512  ;;  %vm923_vm6 = vcmp.lt.s32.totalorder %v891_v33, 512  ;;  %v864_v15 = vadd.s32 96, %v1839_v1 }
  0x54   : > { %v892_v2 = vadd.s32 %v1847_v4, %v859_v39 }
  0x55   : > { %v897_v33 = vadd.s32 %v1847_v4, %v864_v15 }
  0x56   : > { %vm924_vm9 = vcmp.lt.s32.totalorder %v892_v2, 512 }
  0x57   : > { %vm929_vm12 = vcmp.lt.s32.totalorder %v897_v33, 512 }
  0x5c   : > { %685 = vmatmul.bf16.gmra.mxu0 %v553_v41  ;;  %705 = vmatmul.bf16.gmra.mxu1 %v557_v42  ;;  %v862_v41 = vadd.s32 80, %v1839_v1 }
  0x5d   : > { %725 = vmatmul.bf16.gmra.mxu2 %v561_v43  ;;  %745 = vmatmul.bf16.gmra.mxu3 %v565_v44 }
  0x5e   : > { %v895_v5 = vadd.s32 %v1847_v4, %v862_v41 }
  0x60   : > { %vm927_vm10 = vcmp.lt.s32.totalorder %v895_v5, 512 }
  0xa9   : > { %v671_v45 = vpop.f32.mrf.mxu0  ;;  %v1800_v46 = vpop.f32.mrf.mxu1 }
  0xaa   : > { %v949_v29 = vsel %vm917_vm1, %v671_v45, 0.0 }
  0xab   : > { %v1018_v34 = vmul.f32 %v949_v29, %v949_v29 }
  0xb0   : > { %v1802_v17 = vpop.f32.mrf.mxu2  ;;  %v1815_v51 = vpop.f32.mrf.mxu3 }
  0xb1   : > { %v673_v47 = vpop.f32.mrf.mxu0  ;;  %v1811_v48 = vpop.f32.mrf.mxu1 }
  0xb2   : > { %v1444_v49 = vpack.c.bf16 %v673_v47, %v671_v45  ;;  %v1464_v50 = vpack.c.bf16 %v1811_v48, %v1800_v46  ;;  %v950_v21 = vsel %vm918_vm0, %v673_v47, 0.0 }
  0xb3   : > { %v1019_v31 = vmul.f32 %v950_v21, %v950_v21  ;;  %v981_v37 = vadd.f32 %v950_v21, %v949_v29  ;;  %v868_v21 = vadd.s32 128, %v1839_v1 }
  0xb4   : > { %1445 = vst [vmem:[%s1809_s30] sm:$0xff] %v1444_v49  }
  0xb5   : > { %1539 = vst [vmem:[%s1809_s30 + $0x20] sm:$0xff] %v1464_v50   ;;  %v1050_v40 = vadd.f32 %v1019_v31, %v1018_v34 }
  0xb8   : > { %v1819_v52 = vpop.f32.mrf.mxu2  ;;  %v1825_v56 = vpop.f32.mrf.mxu3 }
  0xb9   : > { %v676_v53 = vpop.f32.mrf.mxu0  ;;  %v1821_v54 = vpop.f32.mrf.mxu1  ;;  %v1484_v55 = vpack.c.bf16 %v1819_v52, %v1802_v17  ;;  %v1504_v57 = vpack.c.bf16 %v1825_v56, %v1815_v51 }
  0xba   : > { %v951_v32 = vsel %vm919_vm2, %v676_v53, 0.0  ;;  %v959_v41 = vsel %vm927_vm10, %v1821_v54, 0.0 }
  0xbb   : > { %1543 = vst [vmem:[%s1809_s30 + $0x40] sm:$0xff] %v1484_v55   ;;  %v1020_v38 = vmul.f32 %v951_v32, %v951_v32  ;;  %v982_v44 = vadd.f32 %v981_v37, %v951_v32  ;;  %v894_v55 = vadd.s32 %v1847_v4, %v861_v36 }
  0xbc   : > { %1547 = vst [vmem:[%s1809_s30 + $0x60] sm:$0xff] %v1504_v57  }
  0xbd   : > { %vm926_vm8 = vcmp.lt.s32.totalorder %v894_v55, 512 }
  0xc0   : > { %v1831_v59 = vpop.f32.mrf.mxu2  ;;  %v1837_v0 = vpop.f32.mrf.mxu3 }
  0xc1   : > { %v678_v60 = vpop.f32.mrf.mxu0  ;;  %v1833_v61 = vpop.f32.mrf.mxu1 }
  0xc2   : > { %v1449_v62 = vpack.c.bf16 %v678_v60, %v676_v53  ;;  %v1469_v63 = vpack.c.bf16 %v1833_v61, %v1821_v54  ;;  %v952_v9 = vsel %vm920_vm3, %v678_v60, 0.0  ;;  %v893_v53 = vadd.s32 %v1847_v4, %v860_v35 }
  0xc3   : > { %v1021_v45 = vmul.f32 %v952_v9, %v952_v9  ;;  %v1051_v60 = vadd.f32 %v1050_v40, %v1020_v38  ;;  %v870_v54 = vadd.s32 144, %v1839_v1 }
  0xc4   : > { %1536 = vst [vmem:[%s1809_s30 + $0x8] sm:$0xff] %v1449_v62   ;;  %v983_v62 = vadd.f32 %v982_v44, %v952_v9  ;;  %vm925_vm7 = vcmp.lt.s32.totalorder %v893_v53, 512  ;;  %v869_v53 = vadd.s32 136, %v1839_v1 }
  0xc5   : > { %1540 = vst [vmem:[%s1809_s30 + $0x28] sm:$0xff] %v1469_v63   ;;  %v1052_v12 = vadd.f32 %v1051_v60, %v1021_v45  ;;  %v867_v45 = vadd.s32 120, %v1839_v1 }
  0xc8   : > { %v1845_v3 = vpop.f32.mrf.mxu2  ;;  %v1855_v11 = vpop.f32.mrf.mxu3 }
  0xc9   : > { %v681_v6 = vpop.f32.mrf.mxu0  ;;  %v1850_v7 = vpop.f32.mrf.mxu1  ;;  %v1489_v8 = vpack.c.bf16 %v1845_v3, %v1831_v59  ;;  %v1509_v16 = vpack.c.bf16 %v1855_v11, %v1837_v0 }
  0xca   : > { %v953_v42 = vsel %vm921_vm4, %v681_v6, 0.0 }
  0xcb   : > { %1544 = vst [vmem:[%s1809_s30 + $0x48] sm:$0xff] %v1489_v8   ;;  %v1022_v63 = vmul.f32 %v953_v42, %v953_v42  ;;  %v984_v13 = vadd.f32 %v983_v62, %v953_v42  ;;  %v1028_v62 = vmul.f32 %v959_v41, %v959_v41 }
  0xcc   : > { %1548 = vst [vmem:[%s1809_s30 + $0x68] sm:$0xff] %v1509_v16  }
  0xcd   : > { %v1053_v16 = vadd.f32 %v1052_v12, %v1022_v63  ;;  %v902_v12 = vadd.s32 %v1847_v4, %v869_v53  ;;  %v875_v53 = vadd.s32 184, %v1839_v1 }
  0xcf   : > { %vm934_vm1 = vcmp.lt.s32.totalorder %v902_v12, 512 }
  0xd0   : > { %v1868_v20 = vpop.f32.mrf.mxu2  ;;  %v1876_v28 = vpop.f32.mrf.mxu3 }
  0xd1   : > { %v683_v23 = vpop.f32.mrf.mxu0  ;;  %v1872_v25 = vpop.f32.mrf.mxu1 }
  0xd2   : > { %v1454_v26 = vpack.c.bf16 %v683_v23, %v681_v6  ;;  %v1474_v27 = vpack.c.bf16 %v1872_v25, %v1850_v7  ;;  %v954_v57 = vsel %vm922_vm5, %v683_v23, 0.0  ;;  %v863_v6 = vadd.s32 88, %v1839_v1 }
  0xd3   : > { %v1023_v14 = vmul.f32 %v954_v57, %v954_v57  ;;  %v985_v18 = vadd.f32 %v984_v13, %v954_v57  ;;  %v865_v23 = vadd.s32 104, %v1839_v1  ;;  %v961_v13 = vsel %vm929_vm12, %v1850_v7, 0.0 }
  0xd4   : > { %1537 = vst [vmem:[%s1809_s30 + $0x10] sm:$0xff] %v1454_v26   ;;  %v896_v22 = vadd.s32 %v1847_v4, %v863_v6  ;;  %v957_v26 = vsel %vm925_vm7, %v1800_v46, 0.0  ;;  %v866_v46 = vadd.s32 112, %v1839_v1 }
  0xd5   : > { %1541 = vst [vmem:[%s1809_s30 + $0x30] sm:$0xff] %v1474_v27   ;;  %v958_v27 = vsel %vm926_vm8, %v1811_v48, 0.0  ;;  %v1054_v29 = vadd.f32 %v1053_v16, %v1023_v14  ;;  %v1026_v48 = vmul.f32 %v957_v26, %v957_v26  ;;  %v898_v40 = vadd.s32 %v1847_v4, %v865_v23 }
  0xd6   : > { %vm928_vm11 = vcmp.lt.s32.totalorder %v896_v22, 512  ;;  %v899_v60 = vadd.s32 %v1847_v4, %v866_v46  ;;  %v1030_v23 = vmul.f32 %v961_v13, %v961_v13 }
  0xd7   : > { %v960_v63 = vsel %vm928_vm11, %v1833_v61, 0.0  ;;  %vm930_vm13 = vcmp.lt.s32.totalorder %v898_v40, 512 }
  0xd8   : > { %v1886_v43 = vpop.f32.mrf.mxu2  ;;  %v1894_v58 = vpop.f32.mrf.mxu3  ;;  %v1029_v61 = vmul.f32 %v960_v63, %v960_v63  ;;  %vm931_vm15 = vcmp.lt.s32.totalorder %v899_v60, 512 }
  0xd9   : > { %v686_v47 = vpop.f32.mrf.mxu0  ;;  %v1888_v49 = vpop.f32.mrf.mxu1  ;;  %v1494_v50 = vpack.c.bf16 %v1886_v43, %v1868_v20  ;;  %v1514_v10 = vpack.c.bf16 %v1894_v58, %v1876_v28 }
  0xda   : > { %v955_v8 = vsel %vm923_vm6, %v686_v47, 0.0 }
  0xdb   : > { %1545 = vst [vmem:[%s1809_s30 + $0x50] sm:$0xff] %v1494_v50   ;;  %v1024_v19 = vmul.f32 %v955_v8, %v955_v8  ;;  %v986_v30 = vadd.f32 %v985_v18, %v955_v8  ;;  %v901_v50 = vadd.s32 %v1847_v4, %v868_v21  ;;  %v900_v8 = vadd.s32 %v1847_v4, %v867_v45 }
  0xdc   : > { %1549 = vst [vmem:[%s1809_s30 + $0x70] sm:$0xff] %v1514_v10   ;;  %v903_v18 = vadd.s32 %v1847_v4, %v870_v54  ;;  %v871_v21 = vadd.s32 152, %v1839_v1  ;;  %v876_v45 = vadd.s32 192, %v1839_v1 }
  0xdd   : > { %v1055_v37 = vadd.f32 %v1054_v29, %v1024_v19  ;;  %vm933_vm14 = vcmp.lt.s32.totalorder %v901_v50, 512  ;;  %v962_v19 = vsel %vm930_vm13, %v1872_v25, 0.0  ;;  %vm932_vm0 = vcmp.lt.s32.totalorder %v900_v8, 512 }
  0xde   : > { %v872_v29 = vadd.s32 160, %v1839_v1  ;;  %v965_v25 = vsel %vm933_vm14, %v1802_v17, 0.0  ;;  %vm935_vm2 = vcmp.lt.s32.totalorder %v903_v18, 512 }
  0xdf   : > { %v967_v17 = vsel %vm935_vm2, %v1831_v59, 0.0  ;;  %v909_v59 = vadd.s32 %v1847_v4, %v876_v45 }
  0xe0   : > { %v1907_v24 = vpop.f32.mrf.mxu2  ;;  %v1913_v9 = vpop.f32.mrf.mxu3  ;;  %v905_v46 = vadd.s32 %v1847_v4, %v872_v29 }
  0xe1   : > { %v688_v31 = vpop.f32.mrf.mxu0  ;;  %v708_v32 = vpop.f32.mrf.mxu1  ;;  %vm941_vm7 = vcmp.lt.s32.totalorder %v909_v59, 512 }
  0xe2   : > { %v956_v34 = vsel %vm924_vm9, %v688_v31, 0.0  ;;  %v1459_v35 = vpack.c.bf16 %v688_v31, %v686_v47  ;;  %v1479_v36 = vpack.c.bf16 %v708_v32, %v1888_v49  ;;  %v1027_v47 = vmul.f32 %v958_v27, %v958_v27 }
  0xe3   : > { %v987_v38 = vadd.f32 %v986_v30, %v956_v34  ;;  %v1025_v39 = vmul.f32 %v956_v34, %v956_v34  ;;  %v1031_v30 = vmul.f32 %v962_v19, %v962_v19  ;;  %v904_v34 = vadd.s32 %v1847_v4, %v871_v21 }
  0xe4   : > { %1538 = vst [vmem:[%s1809_s30 + $0x18] sm:$0xff] %v1459_v35   ;;  %v964_v35 = vsel %vm932_vm0, %v708_v32, 0.0  ;;  %vm937_vm4 = vcmp.lt.s32.totalorder %v905_v46, 512  ;;  %vm1087_vm0 = vcmp.eq.s32.totalorder %v1839_v1, 0 }
  0xe5   : > { %v988_v42 = vadd.f32 %v987_v38, %v957_v26  ;;  %v1056_v44 = vadd.f32 %v1055_v37, %v1025_v39  ;;  %1542 = vst [vmem:[%s1809_s30 + $0x38] sm:$0xff] %v1479_v36   ;;  %v873_v39 = vadd.s32 168, %v1839_v1  ;;  %vm936_vm3 = vcmp.lt.s32.totalorder %v904_v34, 512 }
  0xe6   : > { %v968_v54 = vsel %vm936_vm3, %v1845_v3, 0.0 }
  0xe7   : > { %v989_v55 = vadd.f32 %v988_v42, %v958_v27  ;;  %v1057_v57 = vadd.f32 %v1056_v44, %v1026_v48  ;;  %v963_v27 = vsel %vm931_vm15, %v1888_v49, 0.0  ;;  %v966_v49 = vsel %vm934_vm1, %v1819_v52, 0.0 }
  0xe8   : > { %v1928_v2 = vpop.f32.mrf.mxu2  ;;  %v1935_v14 = vpop.f32.mrf.mxu3  ;;  %v1032_v37 = vmul.f32 %v963_v27, %v963_v27  ;;  %v874_v42 = vadd.s32 176, %v1839_v1  ;;  %v1034_v44 = vmul.f32 %v965_v25, %v965_v25  ;;  %v906_v50 = vadd.s32 %v1847_v4, %v873_v39 }
  0xe9   : > { %v990_v5 = vadd.f32 %v989_v55, %v959_v41  ;;  %v1058_v6 = vadd.f32 %v1057_v57, %v1027_v47  ;;  %v1499_v10 = vpack.c.bf16 %v1928_v2, %v1907_v24  ;;  %v1519_v22 = vpack.c.bf16 %v1935_v14, %v1913_v9 }
  0xea   : > { %v1033_v41 = vmul.f32 %v964_v35, %v964_v35  ;;  %v1035_v52 = vmul.f32 %v966_v49, %v966_v49  ;;  %v877_v55 = vadd.s32 200, %v1839_v1  ;;  %vm938_vm5 = vcmp.lt.s32.totalorder %v906_v50, 512 }
  0xeb   : > { %v1059_v15 = vadd.f32 %v1058_v6, %v1028_v62  ;;  %v991_v16 = vadd.f32 %v990_v5, %v960_v63  ;;  %1546 = vst [vmem:[%s1809_s30 + $0x58] sm:$0xff] %v1499_v10   ;;  %v907_v62 = vadd.s32 %v1847_v4, %v874_v42  ;;  %v1036_v63 = vmul.f32 %v967_v17, %v967_v17 }
  0xec   : > { %1550 = vst [vmem:[%s1809_s30 + $0x78] sm:$0xff] %v1519_v22   ;;  %v878_v5 = vadd.s32 208, %v1839_v1  ;;  %v908_v10 = vadd.s32 %v1847_v4, %v875_v53  ;;  %v910_v12 = vadd.s32 %v1847_v4, %v877_v55  ;;  %v970_v3 = vsel %vm938_vm5, %v1886_v43, 0.0 }
  0xed   : > { %v992_v7 = vadd.f32 %v991_v16, %v961_v13  ;;  %v1060_v26 = vadd.f32 %v1059_v15, %v1029_v61  ;;  %v969_v13 = vsel %vm937_vm4, %v1868_v20, 0.0  ;;  %v1037_v61 = vmul.f32 %v968_v54, %v968_v54 }
  0xee   : > { %vm939_vm6 = vcmp.lt.s32.totalorder %v907_v62, 512  ;;  %v911_v18 = vadd.s32 %v1847_v4, %v878_v5  ;;  %v1038_v21 = vmul.f32 %v969_v13, %v969_v13  ;;  %vm940_vm8 = vcmp.lt.s32.totalorder %v908_v10, 512 }
  0xef   : > { %v993_v31 = vadd.f32 %v992_v7, %v962_v19  ;;  %v1061_v33 = vadd.f32 %v1060_v26, %v1030_v23  ;;  %v879_v19 = vadd.s32 216, %v1839_v1  ;;  %v971_v7 = vsel %vm939_vm6, %v1907_v24, 0.0 }
  0xf0   : > { %v880_v26 = vadd.s32 224, %v1839_v1  ;;  %vm942_vm9 = vcmp.lt.s32.totalorder %v910_v12, 512  ;;  %vm943_vm10 = vcmp.lt.s32.totalorder %v911_v18, 512  ;;  %v972_v43 = vsel %vm940_vm8, %v1928_v2, 0.0 }
  0xf1   : > { %v994_v36 = vadd.f32 %v993_v31, %v963_v27  ;;  %v1062_v38 = vadd.f32 %v1061_v33, %v1031_v30  ;;  %v1039_v27 = vmul.f32 %v970_v3, %v970_v3  ;;  %v973_v30 = vsel %vm941_vm7, %v1815_v51, 0.0 }
  0xf2   : > { %v912_v31 = vadd.s32 %v1847_v4, %v879_v19  ;;  %v1040_v34 = vmul.f32 %v971_v7, %v971_v7  ;;  %v974_v24 = vsel %vm942_vm9, %v1825_v56, 0.0  ;;  %v1041_v39 = vmul.f32 %v972_v43, %v972_v43 }
  0xf3   : > { %v1063_v48 = vadd.f32 %v1062_v38, %v1032_v37  ;;  %v995_v40 = vadd.f32 %v994_v36, %v964_v35  ;;  %v881_v35 = vadd.s32 232, %v1839_v1  ;;  %v913_v36 = vadd.s32 %v1847_v4, %v880_v26 }
  0xf4   : > { %v1042_v51 = vmul.f32 %v973_v30, %v973_v30  ;;  %v975_v46 = vsel %vm943_vm10, %v1837_v0, 0.0  ;;  %vm944_vm11 = vcmp.lt.s32.totalorder %v912_v31, 512  ;;  %v1043_v42 = vmul.f32 %v974_v24, %v974_v24 }
  0xf5   : > { %v996_v32 = vadd.f32 %v995_v40, %v965_v25  ;;  %v1064_v47 = vadd.f32 %v1063_v48, %v1033_v41  ;;  %v914_v40 = vadd.s32 %v1847_v4, %v881_v35  ;;  %v883_v41 = vadd.s32 248, %v1839_v1 }
  0xf6   : > { %vm945_vm12 = vcmp.lt.s32.totalorder %v913_v36, 512  ;;  %v1044_v45 = vmul.f32 %v975_v46, %v975_v46  ;;  %vm1089_vm1 = vcmp.eq.s32.totalorder %v1839_v1, 1 }
  0xf7   : > { %v997_v57 = vadd.f32 %v996_v32, %v966_v49  ;;  %v1065_v60 = vadd.f32 %v1064_v47, %v1034_v44  ;;  %v882_v49 = vadd.s32 240, %v1839_v1  ;;  %v976_v32 = vsel %vm944_vm11, %v1855_v11, 0.0 }
  0xf8   : > { %vm946_vm13 = vcmp.lt.s32.totalorder %v914_v40, 512  ;;  %v916_v0 = vadd.s32 %v1847_v4, %v883_v41  ;;  %v977_v53 = vsel %vm945_vm12, %v1876_v28, 0.0 }
  0xf9   : > { %v998_v6 = vadd.f32 %v997_v57, %v967_v17  ;;  %v1066_v8 = vadd.f32 %v1065_v60, %v1035_v52  ;;  %v915_v17 = vadd.s32 %v1847_v4, %v882_v49  ;;  %v1045_v52 = vmul.f32 %v976_v32, %v976_v32 }
  0xfa   : > { %v978_v60 = vsel %vm946_vm13, %v1894_v58, 0.0  ;;  %v1046_v62 = vmul.f32 %v977_v53, %v977_v53  ;;  %vm948_vm15 = vcmp.lt.s32.totalorder %v916_v0, 512 }
  0xfb   : > { %v1067_v15 = vadd.f32 %v1066_v8, %v1036_v63  ;;  %v999_v16 = vadd.f32 %v998_v6, %v968_v54  ;;  %vm947_vm14 = vcmp.lt.s32.totalorder %v915_v17, 512  ;;  %v1047_v5 = vmul.f32 %v978_v60, %v978_v60 }
  0xfc   : > { %v979_v11 = vsel %vm947_vm14, %v1913_v9, 0.0  ;;  %v980_v4 = vsel %vm948_vm15, %v1935_v14, 0.0 }
  0xfd   : > { %v1000_v22 = vadd.f32 %v999_v16, %v969_v13  ;;  %v1068_v23 = vadd.f32 %v1067_v15, %v1037_v61  ;;  %v1048_v10 = vmul.f32 %v979_v11, %v979_v11  ;;  %v1049_v61 = vmul.f32 %v980_v4, %v980_v4 }
  0xff   : > { %v1001_v20 = vadd.f32 %v1000_v22, %v970_v3  ;;  %v1069_v29 = vadd.f32 %v1068_v23, %v1038_v21 }
 0x101   : > { %v1070_v33 = vadd.f32 %v1069_v29, %v1039_v27  ;;  %v1002_v25 = vadd.f32 %v1001_v20, %v971_v7 }
 0x103   : > { %v1071_v37 = vadd.f32 %v1070_v33, %v1040_v34  ;;  %v1003_v38 = vadd.f32 %v1002_v25, %v972_v43 }
 0x105   : > { %v1004_v48 = vadd.f32 %v1003_v38, %v973_v30  ;;  %v1072_v2 = vadd.f32 %v1071_v37, %v1041_v39 }
 0x107   : > { %v1005_v56 = vadd.f32 %v1004_v48, %v974_v24  ;;  %v1073_v44 = vadd.f32 %v1072_v2, %v1042_v51 }
 0x109   : > { %v1006_v47 = vadd.f32 %v1005_v56, %v975_v46  ;;  %v1074_v50 = vadd.f32 %v1073_v44, %v1043_v42 }
 0x10b   : > { %v1075_v55 = vadd.f32 %v1074_v50, %v1044_v45  ;;  %v1007_v57 = vadd.f32 %v1006_v47, %v976_v32 }
 0x10d   : > { %v1008_v63 = vadd.f32 %v1007_v57, %v977_v53  ;;  %v1076_v59 = vadd.f32 %v1075_v55, %v1045_v52 }
 0x10f   : > { %v1009_v54 = vadd.f32 %v1008_v63, %v978_v60  ;;  %v1077_v6 = vadd.f32 %v1076_v59, %v1046_v62 }
 0x111   : > { %v1078_v28 = vadd.f32 %v1077_v6, %v1047_v5  ;;  %v1010_v8 = vadd.f32 %v1009_v54, %v979_v11 }
 0x113   : > { %v1079_v12 = vadd.f32 %v1078_v28, %v1048_v10  ;;  %v1011_v13 = vadd.f32 %v1010_v8, %v980_v4 }
 0x115   : > { %v1012_v58 = vrot.slane %v1011_v13, 4  ;;  %v1080_v15 = vadd.f32 %v1079_v12, %v1049_v61 }
 0x117   : > { %v1013_v16 = vadd.f32 %v1012_v58, %v1011_v13  ;;  %v1081_v18 = vrot.slane %v1080_v15, 4 }
 0x119   : > { %v1014_v3 = vrot.slane %v1013_v16, 2  ;;  %v1082_v19 = vadd.f32 %v1081_v18, %v1080_v15 }
 0x11b   : > { %v1015_v9 = vadd.f32 %v1014_v3, %v1013_v16  ;;  %v1083_v21 = vrot.slane %v1082_v19, 2 }
 0x11d   : > { %v1016_v22 = vrot.slane %v1015_v9, 1  ;;  %v1084_v23 = vadd.f32 %v1083_v21, %v1082_v19 }
 0x11f   : > { %v1017_v14 = vadd.f32 %v1016_v22, %v1015_v9  ;;  %v1085_v7 = vrot.slane %v1084_v23, 1 }
 0x121   : > { %v1086_v26 = vadd.f32 %v1085_v7, %v1084_v23  ;;  %v1088_v20 = vsel %vm1087_vm0, %v1017_v14, 0.0 }
 0x123   : > { %v1090_v27 = vsel %vm1089_vm1, %v1086_v26, 0.0 }
 0x124   : > { %v1091_v29 = vadd.f32 %v1090_v27, %v1088_v20 }
 0x126   : > { %1092 = vst [vmem:[%s345_s8] sm:$0xff] %v1091_v29 }
 0x127 PF: > { %s16_s20 = sadd.s32 1, %s1623_s20   ;;  %s2010_s18 = smov %s1619_s19 }
 0x128   : > { %p13_p6 = scmp.ge.s32.totalorder %s16_s20, 4   ;;  %s2011_s19 = smov %s2013_s21 }
 0x12a   :  { %15 = sbr.rel (!%p13_p6) target bundleno = 2 (0x2), region = 95 }

// kernel: reverse.2
= control target key start
LH: loop header
LB: loop body
LE: loop exit
PB: predicated region body
PF: predicated region fallthrough
CT: control target
= control target key end

     0   :  { %v2_v0 = vlaneseq  ;;  %s127_s0 = inlined_call_operand.vmem [shape: f32[16], index: 0, kind: input, shape index: {}]   ;;  %s128_s1 = inlined_call_operand.vmem [shape: f32[16], index: 1, kind: output, shape index: {}]  }
   0x2   :  { %v3_v1 = vsub.s32 15, %v2_v0 }
   0x4   :  { %4 = vset.pattern.permute.xlu0 %v3_v1 }
   0x5   :  { %v45_v2 = vld [vmem:[#allocation1] sm:$0x1]  ;;  %v22_v3 = vld [vmem:[%s127_s0] sm:$0x1]  ;;  %v60_v10 = vshrl.u32 %v2_v0, 7 }
   0x6   :  { %46 = vst [vmem:[#allocation0] sm:$0x1] %v45_v2 }
   0x7   :  { %23 = vst [vmem:[#allocation1 + $0x1] sm:$0x1] %v22_v3  ;;  %vm61_vm0 = vcmp.lt.s32.totalorder %v60_v10, 1 }
   0xd   :  { %v48_v4 = vld [vmem:[#allocation0 + $0x7] ss:$-1 sm:$0xff] }
   0xe   :  { %v49_v5 = vrot.slane %v48_v4, 7  ;;  %v42_v6 = vld [vmem:[#allocation1 + $0x1] sm:$0x1] }
   0xf   :  { %44 = vst [vmem:[#allocation0 + $0x8] sm:$0x1] %v42_v6 }
  0x10   :  { %50 = vperm.xlu0 %4, %v49_v5  }
  0x16   :  { %v55_v7 = vld [vmem:[#allocation0 + $0xf] ss:$-1 sm:$0xff] }
  0x17   :  { %v56_v8 = vrot.slane %v55_v7, 7 }
  0x19   :  { %57 = vperm.xlu0 %4, %v56_v8  }
  0x82   :  { %v51_v9 = vpop.permute.xlu0 %50 }
  0x83   :  { %52 = vst [vmem:[#allocation2] sm:$0xff] %v51_v9 }
  0x8b   :  { %v58_v11 = vpop.permute.xlu0 %57 }
  0x8c   :  { %62 = vst.msk [vmem:[#allocation2] sm:$0xff] %vm61_vm0, %v58_v11 }
  0x93   :  { %v65_v12 = vld [vmem:[#allocation2] sm:$0x1] }
  0x94   :  { %68 = vst [vmem:[#allocation3] sm:$0x1] %v65_v12 }
  0x9b   :  { %v85_v13 = vld [vmem:[#allocation3] sm:$0x1] }
  0x9c   :  { %86 = vst [vmem:[%s128_s1] sm:$0x1] %v85_v13 }

// kernel: bottleneck_gated_forward.8
= control target key start
LH: loop header
LB: loop body
LE: loop exit
PB: predicated region body
PF: predicated region fallthrough
CT: control target
= control target key end

     0   :  { %s856_s12 = smov 0   ;;  %s858_s13 = smov 0   ;;  %s948_s0 = inlined_call_operand.vmem [shape: bf16[128,128], index: 0, kind: input, shape index: {}]   ;;  %s949_s1 = inlined_call_operand.vmem [shape: bf16[128,128], index: 1, kind: input, shape index: {}]   ;;  %s950_s2 = inlined_call_operand.vmem [shape: bf16[128,128], index: 2, kind: output, shape index: {0}]   ;;  %s951_s3 = inlined_call_operand.vmem [shape: f32[16,128], index: 3, kind: output, shape index: {1}]  }
   0x1   :  { %s860_s14 = smov 0  }
   0x2 LB: > { %s33_s15 = sadd.s32 1, %s830_s13  ;;  %p672_p0 = scmp.ge.s32.totalorder %s834_s14, 1  ;;  %s834_s14 = sphi %s860_s14, %s14_s14   ;;  %s830_s13 = sphi %s858_s13, %s953_s13   ;;  %s826_s12 = sphi %s856_s12, %s952_s12  }
   0x3   : > { %p35_p1 = scmp.ge.s32.totalorder %s33_s15, 2  ;;  %p185_p2 = scmp.lt.s32.totalorder %s834_s14, 3 }
   0x5   : > { %s955_s15 = smov (%p35_p1, %s33_s15), 0  ;;  %p186_p3 = pnand %p672_p0, %p185_p2 }
   0x6   : > { %s673_s24 = sshll.u32 (!%p186_p3), %s826_s12, 3  ;;  %s726_s10 = sshll.u32 (!%p186_p3), %s826_s12, 6 }
   0x7   : > { %189 = sbr.rel (%p186_p3) target bundleno = 211 (0xd3), region = 28  ;;  %p231_p4 = scmp.lt.s32.totalorder (!%p186_p3), %s673_s24, 15 }
   0x8   : > { %p257_p5 = scmp.lt.s32.totalorder (!%p186_p3), %s826_s12, 1 }
   0xc   : > { %v740_v0 = vld [vmem:[%s949_s1 + $0x38] sm:$0xff]  ;;  %v739_v1 = vld [vmem:[%s949_s1 + $0x30] sm:$0xff]  ;;  %v738_v2 = vld [vmem:[%s949_s1 + $0x28] sm:$0xff]  ;;  %s957_s24 = smov (!%p231_p4, %s673_s24), 15  ;;  %v437_v12 = vlaneseq  ;;  %v446_v14 = vstv %s726_s10  ;;  %s959_s12 = smov (!%p257_p5, %s826_s12), 1 }
   0xd   : > { %380 = vmatpush.bf16.msra.mxu0 %v740_v0  ;;  %764 = vmatpush.bf16.msra.mxu1 %v740_v0  ;;  %v737_v3 = vld [vmem:[%s949_s1 + $0x20] sm:$0xff]  ;;  %v736_v4 = vld [vmem:[%s949_s1 + $0x18] sm:$0xff]  ;;  %v735_v5 = vld [vmem:[%s949_s1 + $0x10] sm:$0xff]  ;;  %s674_s4 = sshll.u32 %s957_s24, 2  ;;  %s677_s18 = sshll.u32 %s959_s12, 3 }
   0xe   : > { %765 = vmatpush.bf16.msra.mxu2 %v740_v0  ;;  %766 = vmatpush.bf16.msra.mxu3 %v740_v0  ;;  %v734_v6 = vld [vmem:[%s949_s1 + $0x8] sm:$0xff]  ;;  %v733_v7 = vld [vmem:[%s949_s1] sm:$0xff]  ;;  %s237_s9 = scalar_lea.vmem %s948_s0, %s674_s4  ;;  %v910_v13 = vshrl.u32 %v437_v12, 7  ;;  %s925_s17 = scalar_lea.vmem %s950_s2, %s674_s4 }
   0xf   : > { %v729_v8 = vld [vmem:[%s237_s9] sm:$0xff]  ;;  %v730_v9 = vld [vmem:[%s237_s9 + $0x8] sm:$0xff]  ;;  %v731_v10 = vld [vmem:[%s237_s9 + $0x10] sm:$0xff]  ;;  %s263_s21 = scalar_lea.vmem %s951_s3, %s677_s18 }
  0x10   : > { %v732_v11 = vld [vmem:[%s237_s9 + $0x18] sm:$0xff]  ;;  %v440_v15 = vadd.s32 16, %v910_v13  ;;  %v439_v16 = vadd.s32 8, %v910_v13  ;;  %v447_v18 = vadd.s32 %v446_v14, %v910_v13  ;;  %v442_v20 = vadd.s32 32, %v910_v13 }
  0x11   : > { %381 = vmatpush.bf16.msra.mxu0 %v739_v1  ;;  %767 = vmatpush.bf16.msra.mxu1 %v739_v1  ;;  %v441_v21 = vadd.s32 24, %v910_v13  ;;  %v444_v25 = vadd.s32 48, %v910_v13  ;;  %v443_v27 = vadd.s32 40, %v910_v13  ;;  %v445_v31 = vadd.s32 56, %v910_v13 }
  0x12   : > { %768 = vmatpush.bf16.msra.mxu2 %v739_v1  ;;  %769 = vmatpush.bf16.msra.mxu3 %v739_v1  ;;  %v449_v22 = vadd.s32 %v446_v14, %v440_v15  ;;  %v448_v23 = vadd.s32 %v446_v14, %v439_v16  ;;  %vm455_vm0 = vcmp.lt.s32.totalorder %v447_v18, 128  ;;  %v451_v24 = vadd.s32 %v446_v14, %v442_v20 }
  0x13   : > { %v450_v26 = vadd.s32 %v446_v14, %v441_v21  ;;  %v453_v32 = vadd.s32 %v446_v14, %v444_v25  ;;  %v452_v38 = vadd.s32 %v446_v14, %v443_v27  ;;  %v454_v44 = vadd.s32 %v446_v14, %v445_v31 }
  0x14   : > { %vm457_vm1 = vcmp.lt.s32.totalorder %v449_v22, 128  ;;  %vm456_vm2 = vcmp.lt.s32.totalorder %v448_v23, 128  ;;  %vm459_vm3 = vcmp.lt.s32.totalorder %v451_v24, 128  ;;  %vm505_vm8 = vcmp.eq.s32.totalorder %v910_v13, 0 }
  0x15   : > { %382 = vmatpush.bf16.msra.mxu0 %v738_v2  ;;  %770 = vmatpush.bf16.msra.mxu1 %v738_v2  ;;  %vm458_vm4 = vcmp.lt.s32.totalorder %v450_v26, 128  ;;  %vm460_vm5 = vcmp.lt.s32.totalorder %v452_v38, 128  ;;  %vm461_vm6 = vcmp.lt.s32.totalorder %v453_v32, 128  ;;  %vm462_vm7 = vcmp.lt.s32.totalorder %v454_v44, 128 }
  0x16   : > { %771 = vmatpush.bf16.msra.mxu2 %v738_v2  ;;  %772 = vmatpush.bf16.msra.mxu3 %v738_v2  ;;  %vm507_vm9 = vcmp.eq.s32.totalorder %v910_v13, 1 }
  0x19   : > { %383 = vmatpush.bf16.msra.mxu0 %v737_v3  ;;  %773 = vmatpush.bf16.msra.mxu1 %v737_v3 }
  0x1a   : > { %774 = vmatpush.bf16.msra.mxu2 %v737_v3  ;;  %775 = vmatpush.bf16.msra.mxu3 %v737_v3 }
  0x1d   : > { %384 = vmatpush.bf16.msra.mxu0 %v736_v4  ;;  %776 = vmatpush.bf16.msra.mxu1 %v736_v4 }
  0x1e   : > { %777 = vmatpush.bf16.msra.mxu2 %v736_v4  ;;  %778 = vmatpush.bf16.msra.mxu3 %v736_v4 }
  0x21   : > { %385 = vmatpush.bf16.msra.mxu0 %v735_v5  ;;  %779 = vmatpush.bf16.msra.mxu1 %v735_v5 }
  0x22   : > { %780 = vmatpush.bf16.msra.mxu2 %v735_v5  ;;  %781 = vmatpush.bf16.msra.mxu3 %v735_v5 }
  0x25   : > { %386 = vmatpush.bf16.msra.mxu0 %v734_v6  ;;  %782 = vmatpush.bf16.msra.mxu1 %v734_v6 }
  0x26   : > { %783 = vmatpush.bf16.msra.mxu2 %v734_v6  ;;  %784 = vmatpush.bf16.msra.mxu3 %v734_v6 }
  0x29   : > { %387 = vmatpush.bf16.msra.mxu0 %v733_v7  ;;  %785 = vmatpush.bf16.msra.mxu1 %v733_v7 }
  0x2a   : > { %786 = vmatpush.bf16.msra.mxu2 %v733_v7  ;;  %787 = vmatpush.bf16.msra.mxu3 %v733_v7 }
  0x2c   : > { %388 = vmatmul.bf16.vlgmr.msra.gmra.mxu0 %v729_v8  ;;  %393 = vmatmul.bf16.vlgmr.msra.gmra.mxu1 %v730_v9 }
  0x2d   : > { %398 = vmatmul.bf16.vlgmr.msra.gmra.mxu2 %v731_v10  ;;  %403 = vmatmul.bf16.vlgmr.msra.gmra.mxu3 %v732_v11 }
  0xa9   : > { %v389_v17 = vpop.f32.mrf.mxu0  ;;  %v394_v19 = vpop.f32.mrf.mxu1 }
  0xaa   : > { %v463_v28 = vsel %vm455_vm0, %v389_v17, 0.0  ;;  %v465_v35 = vsel %vm457_vm1, %v394_v19, 0.0 }
  0xab   : > { %v484_v39 = vmul.f32 %v463_v28, %v463_v28  ;;  %v486_v45 = vmul.f32 %v465_v35, %v465_v35 }
  0xb0   : > { %v399_v29 = vpop.f32.mrf.mxu2  ;;  %v404_v30 = vpop.f32.mrf.mxu3 }
  0xb1   : > { %v391_v33 = vpop.f32.mrf.mxu0  ;;  %v396_v34 = vpop.f32.mrf.mxu1  ;;  %v467_v46 = vsel %vm459_vm3, %v399_v29, 0.0  ;;  %v469_v59 = vsel %vm461_vm6, %v404_v30, 0.0 }
  0xb2   : > { %v464_v36 = vsel %vm456_vm2, %v391_v33, 0.0  ;;  %v744_v37 = vpack.c.bf16 %v391_v33, %v389_v17  ;;  %v749_v42 = vpack.c.bf16 %v396_v34, %v394_v19  ;;  %v466_v43 = vsel %vm458_vm4, %v396_v34, 0.0 }
  0xb3   : > { %v471_v40 = vadd.f32 %v464_v36, %v463_v28  ;;  %v485_v41 = vmul.f32 %v464_v36, %v464_v36  ;;  %v487_v50 = vmul.f32 %v466_v43, %v466_v43  ;;  %v488_v52 = vmul.f32 %v467_v46, %v467_v46 }
  0xb4   : > { %745 = vst [vmem:[%s925_s17] sm:$0xff] %v744_v37   ;;  %v490_v1 = vmul.f32 %v469_v59, %v469_v59 }
  0xb5   : > { %v492_v47 = vadd.f32 %v485_v41, %v484_v39  ;;  %v472_v48 = vadd.f32 %v471_v40, %v465_v35  ;;  %761 = vst [vmem:[%s925_s17 + $0x8] sm:$0xff] %v749_v42  }
  0xb7   : > { %v473_v49 = vadd.f32 %v472_v48, %v466_v43  ;;  %v493_v51 = vadd.f32 %v492_v47, %v486_v45 }
  0xb8   : > { %v401_v53 = vpop.f32.mrf.mxu2  ;;  %v406_v54 = vpop.f32.mrf.mxu3 }
  0xb9   : > { %v494_v55 = vadd.f32 %v493_v51, %v487_v50  ;;  %v468_v56 = vsel %vm460_vm5, %v401_v53, 0.0  ;;  %v474_v57 = vadd.f32 %v473_v49, %v467_v46  ;;  %v754_v58 = vpack.c.bf16 %v401_v53, %v399_v29 }
  0xba   : > { %v759_v60 = vpack.c.bf16 %v406_v54, %v404_v30  ;;  %v489_v62 = vmul.f32 %v468_v56, %v468_v56  ;;  %v470_v0 = vsel %vm462_vm7, %v406_v54, 0.0 }
  0xbb   : > { %v475_v61 = vadd.f32 %v474_v57, %v468_v56  ;;  %v495_v63 = vadd.f32 %v494_v55, %v488_v52  ;;  %762 = vst [vmem:[%s925_s17 + $0x10] sm:$0xff] %v754_v58   ;;  %v491_v5 = vmul.f32 %v470_v0, %v470_v0 }
  0xbc   : > { %763 = vst [vmem:[%s925_s17 + $0x18] sm:$0xff] %v759_v60  }
  0xbd   : > { %v496_v2 = vadd.f32 %v495_v63, %v489_v62  ;;  %v476_v3 = vadd.f32 %v475_v61, %v469_v59 }
  0xbf   : > { %v477_v4 = vadd.f32 %v476_v3, %v470_v0  ;;  %v497_v6 = vadd.f32 %v496_v2, %v490_v1 }
  0xc1   : > { %v478_v7 = vrot.slane %v477_v4, 4  ;;  %v498_v8 = vadd.f32 %v497_v6, %v491_v5 }
  0xc3   : > { %v479_v9 = vadd.f32 %v478_v7, %v477_v4  ;;  %v499_v10 = vrot.slane %v498_v8, 4 }
  0xc5   : > { %v480_v11 = vrot.slane %v479_v9, 2  ;;  %v500_v12 = vadd.f32 %v499_v10, %v498_v8 }
  0xc7   : > { %v481_v14 = vadd.f32 %v480_v11, %v479_v9  ;;  %v501_v15 = vrot.slane %v500_v12, 2 }
  0xc9   : > { %v482_v16 = vrot.slane %v481_v14, 1  ;;  %v502_v17 = vadd.f32 %v501_v15, %v500_v12 }
  0xcb   : > { %v483_v18 = vadd.f32 %v482_v16, %v481_v14  ;;  %v503_v19 = vrot.slane %v502_v17, 1 }
  0xcd   : > { %v504_v20 = vadd.f32 %v503_v19, %v502_v17  ;;  %v506_v21 = vsel %vm505_vm8, %v483_v18, 0.0 }
  0xcf   : > { %v508_v22 = vsel %vm507_vm9, %v504_v20, 0.0 }
  0xd0   : > { %v509_v23 = vadd.f32 %v508_v22, %v506_v21 }
  0xd2   : > { %510 = vst [vmem:[%s263_s21] sm:$0xff] %v509_v23 }
  0xd3 PF: > { %s14_s14 = sadd.s32 1, %s834_s14   ;;  %s952_s12 = smov %s830_s13 }
  0xd4   : > { %p11_p6 = scmp.ge.s32.totalorder %s14_s14, 4   ;;  %s953_s13 = smov %s955_s15 }
  0xd6   :  { %13 = sbr.rel (!%p11_p6) target bundleno = 2 (0x2), region = 81 }

// kernel: bottleneck_gated_forward.6
= control target key start
LH: loop header
LB: loop body
LE: loop exit
PB: predicated region body
PF: predicated region fallthrough
CT: control target
= control target key end

     0   :  { %s826_s15 = smov 0   ;;  %s828_s16 = smov 0   ;;  %s896_s0 = inlined_call_operand.vmem [shape: bf16[128,128], index: 0, kind: input, shape index: {}]   ;;  %s897_s1 = inlined_call_operand.vmem [shape: bf16[128,128], index: 1, kind: input, shape index: {}]   ;;  %s898_s2 = inlined_call_operand.vmem [shape: f32[1,128], index: 2, kind: input, shape index: {}]   ;;  %s899_s3 = inlined_call_operand.vmem [shape: f32[1,128], index: 3, kind: input, shape index: {}]   ;;  %s900_s4 = inlined_call_operand.vmem [shape: bf16[128,128], index: 4, kind: output, shape index: {}]  }
   0x1   :  { %s830_s17 = smov 0  }
   0x2 LB: > { %s33_s18 = sadd.s32 1, %s795_s16  ;;  %p638_p0 = scmp.ge.s32.totalorder %s799_s17, 1  ;;  %s799_s17 = sphi %s830_s17, %s14_s17   ;;  %s795_s16 = sphi %s828_s16, %s902_s16   ;;  %s791_s15 = sphi %s826_s15, %s901_s15  }
   0x3   : > { %p35_p1 = scmp.ge.s32.totalorder %s33_s18, 2  ;;  %p221_p2 = scmp.lt.s32.totalorder %s799_s17, 3 }
   0x5   : > { %s904_s18 = smov (%p35_p1, %s33_s18), 0  ;;  %p222_p3 = pnand %p638_p0, %p221_p2 }
   0x6   : > { %s639_s21 = sshll.u32 (!%p222_p3), %s791_s15, 3 }
   0x7   : > { %225 = sbr.rel (%p222_p3) target bundleno = 189 (0xbd), region = 36  ;;  %p268_p4 = scmp.lt.s32.totalorder (!%p222_p3), %s639_s21, 15 }
   0xc   : > { %v684_v0 = vld [vmem:[%s897_s1 + $0x38] sm:$0xff]  ;;  %v683_v1 = vld [vmem:[%s897_s1 + $0x30] sm:$0xff]  ;;  %s906_s21 = smov (!%p268_p4, %s639_s21), 15  ;;  %v682_v2 = vld [vmem:[%s897_s1 + $0x28] sm:$0xff] }
   0xd   : > { %436 = vmatpush.bf16.msra.mxu0 %v684_v0  ;;  %727 = vmatpush.bf16.msra.mxu1 %v684_v0  ;;  %s640_s24 = sshll.u32 %s906_s21, 2  ;;  %v681_v4 = vld [vmem:[%s897_s1 + $0x20] sm:$0xff]  ;;  %v680_v14 = vld [vmem:[%s897_s1 + $0x18] sm:$0xff]  ;;  %v679_v24 = vld [vmem:[%s897_s1 + $0x10] sm:$0xff] }
   0xe   : > { %728 = vmatpush.bf16.msra.mxu2 %v684_v0  ;;  %729 = vmatpush.bf16.msra.mxu3 %v684_v0  ;;  %s274_s29 = scalar_lea.vmem %s896_s0, %s640_s24  ;;  %v775_v9 = vld [vmem:[%s898_s2] ss:$0 sm:$0xff]  ;;  %v678_v33 = vld [vmem:[%s897_s1 + $0x8] sm:$0xff]  ;;  %s298_s25 = scalar_lea.vmem %s900_s4, %s640_s24 }
   0xf   : > { %v686_v3 = vld [vmem:[%s274_s29] sm:$0xff]   ;;  %v721_v5 = vld [vmem:[%s274_s29 + $0x8] sm:$0xff]   ;;  %v722_v6 = vld [vmem:[%s274_s29 + $0x10] sm:$0xff]  }
  0x10   : > { %v723_v7 = vld [vmem:[%s274_s29 + $0x18] sm:$0xff]   ;;  %v687_v8 = vunpack.c.l.bf16 %v686_v3  ;;  %v688_v10 = vunpack.c.h.bf16 %v686_v3  ;;  %v691_v11 = vunpack.c.l.bf16 %v721_v5  ;;  %v692_v12 = vunpack.c.h.bf16 %v721_v5  ;;  %v776_v19 = vld [vmem:[%s899_s3] ss:$0 sm:$0xff] }
  0x11   : > { %437 = vmatpush.bf16.msra.mxu0 %v683_v1  ;;  %730 = vmatpush.bf16.msra.mxu1 %v683_v1  ;;  %v695_v13 = vunpack.c.l.bf16 %v722_v6  ;;  %v696_v15 = vunpack.c.h.bf16 %v722_v6  ;;  %v699_v16 = vunpack.c.l.bf16 %v723_v7  ;;  %v700_v17 = vunpack.c.h.bf16 %v723_v7  ;;  %v677_v41 = vld [vmem:[%s897_s1] sm:$0xff] }
  0x12   : > { %731 = vmatpush.bf16.msra.mxu2 %v683_v1  ;;  %732 = vmatpush.bf16.msra.mxu3 %v683_v1  ;;  %v332_v18 = vmul.f32 %v775_v9, %v687_v8  ;;  %v333_v20 = vmul.f32 %v775_v9, %v688_v10  ;;  %v334_v21 = vmul.f32 %v775_v9, %v691_v11 }
  0x13   : > { %v335_v22 = vmul.f32 %v775_v9, %v692_v12  ;;  %v336_v23 = vmul.f32 %v775_v9, %v695_v13  ;;  %v337_v25 = vmul.f32 %v775_v9, %v696_v15  ;;  %v338_v26 = vmul.f32 %v775_v9, %v699_v16 }
  0x14   : > { %v339_v27 = vmul.f32 %v775_v9, %v700_v17  ;;  %v344_v28 = vadd.f32 %v776_v19, %v332_v18  ;;  %v345_v29 = vadd.f32 %v776_v19, %v333_v20  ;;  %v346_v30 = vadd.f32 %v776_v19, %v334_v21 }
  0x15   : > { %438 = vmatpush.bf16.msra.mxu0 %v682_v2  ;;  %733 = vmatpush.bf16.msra.mxu1 %v682_v2  ;;  %v347_v31 = vadd.f32 %v776_v19, %v335_v22  ;;  %v348_v32 = vadd.f32 %v776_v19, %v336_v23  ;;  %v349_v34 = vadd.f32 %v776_v19, %v337_v25 }
  0x16   : > { %734 = vmatpush.bf16.msra.mxu2 %v682_v2  ;;  %735 = vmatpush.bf16.msra.mxu3 %v682_v2  ;;  %v350_v35 = vadd.f32 %v776_v19, %v338_v26  ;;  %v351_v36 = vadd.f32 %v776_v19, %v339_v27  ;;  %v352_v37 = vmax.f32 %v344_v28, 0.0  ;;  %v353_v38 = vmax.f32 %v345_v29, 0.0 }
  0x17   : > { %v354_v39 = vmax.f32 %v346_v30, 0.0  ;;  %v355_v40 = vmax.f32 %v347_v31, 0.0  ;;  %v356_v42 = vmax.f32 %v348_v32, 0.0  ;;  %v357_v43 = vmax.f32 %v349_v34, 0.0 }
  0x18   : > { %v358_v44 = vmax.f32 %v350_v35, 0.0  ;;  %v359_v45 = vmax.f32 %v351_v36, 0.0  ;;  %v360_v46 = vpack.c.bf16 %v353_v38, %v352_v37 }
  0x19   : > { %439 = vmatpush.bf16.msra.mxu0 %v681_v4  ;;  %736 = vmatpush.bf16.msra.mxu1 %v681_v4  ;;  %v361_v47 = vpack.c.bf16 %v355_v40, %v354_v39  ;;  %v362_v48 = vpack.c.bf16 %v357_v43, %v356_v42 }
  0x1a   : > { %737 = vmatpush.bf16.msra.mxu2 %v681_v4  ;;  %738 = vmatpush.bf16.msra.mxu3 %v681_v4  ;;  %v363_v49 = vpack.c.bf16 %v359_v45, %v358_v44 }
  0x1d   : > { %440 = vmatpush.bf16.msra.mxu0 %v680_v14  ;;  %739 = vmatpush.bf16.msra.mxu1 %v680_v14 }
  0x1e   : > { %740 = vmatpush.bf16.msra.mxu2 %v680_v14  ;;  %741 = vmatpush.bf16.msra.mxu3 %v680_v14 }
  0x21   : > { %441 = vmatpush.bf16.msra.mxu0 %v679_v24  ;;  %742 = vmatpush.bf16.msra.mxu1 %v679_v24 }
  0x22   : > { %743 = vmatpush.bf16.msra.mxu2 %v679_v24  ;;  %744 = vmatpush.bf16.msra.mxu3 %v679_v24 }
  0x25   : > { %442 = vmatpush.bf16.msra.mxu0 %v678_v33  ;;  %745 = vmatpush.bf16.msra.mxu1 %v678_v33 }
  0x26   : > { %746 = vmatpush.bf16.msra.mxu2 %v678_v33  ;;  %747 = vmatpush.bf16.msra.mxu3 %v678_v33 }
  0x29   : > { %443 = vmatpush.bf16.msra.mxu0 %v677_v41  ;;  %748 = vmatpush.bf16.msra.mxu1 %v677_v41 }
  0x2a   : > { %749 = vmatpush.bf16.msra.mxu2 %v677_v41  ;;  %750 = vmatpush.bf16.msra.mxu3 %v677_v41 }
  0x2c   : > { %444 = vmatmul.bf16.vlgmr.msra.gmra.mxu0 %v360_v46  ;;  %449 = vmatmul.bf16.vlgmr.msra.gmra.mxu1 %v361_v47 }
  0x2d   : > { %454 = vmatmul.bf16.vlgmr.msra.gmra.mxu2 %v362_v48  ;;  %459 = vmatmul.bf16.vlgmr.msra.gmra.mxu3 %v363_v49 }
  0xa9   : > { %v445_v50 = vpop.f32.mrf.mxu0  ;;  %v450_v51 = vpop.f32.mrf.mxu1 }
  0xb0   : > { %v455_v52 = vpop.f32.mrf.mxu2  ;;  %v460_v53 = vpop.f32.mrf.mxu3 }
  0xb1   : > { %v447_v54 = vpop.f32.mrf.mxu0  ;;  %v452_v55 = vpop.f32.mrf.mxu1 }
  0xb2   : > { %v704_v56 = vpack.c.bf16 %v447_v54, %v445_v50  ;;  %v709_v57 = vpack.c.bf16 %v452_v55, %v450_v51 }
  0xb4   : > { %705 = vst [vmem:[%s298_s25] sm:$0xff] %v704_v56  }
  0xb5   : > { %724 = vst [vmem:[%s298_s25 + $0x8] sm:$0xff] %v709_v57  }
  0xb8   : > { %v457_v58 = vpop.f32.mrf.mxu2  ;;  %v462_v59 = vpop.f32.mrf.mxu3 }
  0xb9   : > { %v714_v60 = vpack.c.bf16 %v457_v58, %v455_v52  ;;  %v719_v61 = vpack.c.bf16 %v462_v59, %v460_v53 }
  0xbb   : > { %725 = vst [vmem:[%s298_s25 + $0x10] sm:$0xff] %v714_v60  }
  0xbc   : > { %726 = vst [vmem:[%s298_s25 + $0x18] sm:$0xff] %v719_v61  }
  0xbd PF: > { %s14_s17 = sadd.s32 1, %s799_s17   ;;  %s901_s15 = smov %s795_s16 }
  0xbe   : > { %p11_p5 = scmp.ge.s32.totalorder %s14_s17, 4   ;;  %s902_s16 = smov %s904_s18 }
  0xc0   :  { %13 = sbr.rel (!%p11_p5) target bundleno = 2 (0x2), region = 83 }

// kernel: bottleneck_gated_forward.9
= control target key start
LH: loop header
LB: loop body
LE: loop exit
PB: predicated region body
PF: predicated region fallthrough
CT: control target
= control target key end

     0   :  { %11 = vsyncpa [#allocation4], 0  ;;  %s1246_s0 = inlined_call_operand.vmem [shape: bf16[128,128], index: 0, kind: input, shape index: {}]   ;;  %s1247_s1 = inlined_call_operand.vmem [shape: bf16[128,128], index: 1, kind: input, shape index: {}]   ;;  %s1248_s2 = inlined_call_operand.vmem [shape: f32[1,128], index: 2, kind: input, shape index: {}]   ;;  %s1249_s3 = inlined_call_operand.vmem [shape: f32[1,128], index: 3, kind: input, shape index: {}]   ;;  %s1250_s4 = inlined_call_operand.vmem [shape: bf16[128,128], index: 4, kind: input, shape index: {}]   ;;  %s1251_s5 = inlined_call_operand.vmem [shape: f32[1,128], index: 5, kind: input, shape index: {}]   ;;  %s1252_s6 = inlined_call_operand.hbm [shape: f32[128,128], index: 6, kind: output, shape index: {}]  }
   0x1   :  { %13 = vsyncpa [#allocation4 + $0x1], 0  ;;  %s1092_s21 = smov 0   ;;  %s1094_s22 = smov 0  }
   0x2   :  { %s1096_s23 = smov 0   ;;  %s1098_s24 = smov 0  }
   0x3   :  { %s1100_s25 = smov 0   ;;  %s1102_s26 = smov 0  }
   0x4 LB: > { %s793_s27 = sadd.s32 4294967295, %s1053_s26   ;;  %s794_s28 = sadd.s32 4294967294, %s1053_s26   ;;  %s1053_s26 = sphi %s1102_s26, %s19_s26   ;;  %s1049_s25 = sphi %s1100_s25, %s1259_s25   ;;  %s1045_s24 = sphi %s1098_s24, %s1258_s24   ;;  %s1041_s23 = sphi %s1096_s23, %s1257_s23   ;;  %s1037_s22 = sphi %s1094_s22, %s1256_s22   ;;  %s1033_s21 = sphi %s1092_s21, %s1255_s21  }
   0x5   : > { %s38_s29 = sadd.s32 1, %s1049_s25  ;;  %s209_s30 = sadd.s32 1, %s1041_s23 }
   0x6   : > { %p40_p0 = scmp.ge.s32.totalorder %s38_s29, 2  ;;  %p219_p1 = scmp.ne.s32.totalorder %s1041_s23, %s1037_s22 }
   0x7   : > { %p220_p2 = scmp.eq.s32.totalorder %s793_s27, 1  ;;  %p225_p3 = scmp.ne.s32.totalorder %s1037_s22, %s1033_s21 }
   0x8   : > { %s1261_s29 = smov (%p40_p0, %s38_s29), 0  ;;  %p226_p5 = scmp.eq.s32.totalorder %s794_s28, 1 }
   0x9   : > { %p1132_p4 = por %p220_p2, %p219_p1  ;;  %s204_s8 = ssub.s32 %s1049_s25, %s1261_s29 }
   0xa   : > { %p801_p6 = scmp.ge.s32.totalorder %s1053_s26, 1  ;;  %p207_p7 = scmp.eq.s32.totalorder %s204_s8, 0 }
   0xb   : > { %p1139_p8 = por %p226_p5, %p225_p3  ;;  %p298_p9 = scmp.lt.s32.totalorder %s1053_s26, 3 }
   0xc   : > { %s1145_s10 = scalar_select %p207_p7, %s1041_s23, %s209_s30  }
   0xd   : > { %p299_p10 = pnand %p801_p6, %p298_p9 }
   0xe   : > { %s803_s13 = sshll.u32 (!%p299_p10), %s1045_s24, 3  ;;  %s353_s14 = sand.u32 (!%p299_p10), 1, %s1037_s22  }
   0xf   : > { %302 = sbr.rel (%p299_p10) target bundleno = 202 (0xca), region = 44  ;;  %p357_p11 = scmp.lt.s32.totalorder (!%p299_p10), %s803_s13, 15 }
  0x10   : > { %s802_s15 = sshll.u32 (!%p299_p10), %s353_s14, 6  ;;  %s630_s30 = scalar_lea.sflag (!%p299_p10), [#allocation4], %s353_s14 }
  0x11   : > { %s995_s17 = scalar_lea.hbm (!%p299_p10), %s1252_s6, 128 }
  0x14   : > { %v851_v0 = vld [vmem:[%s1247_s1 + $0x38] sm:$0xff]  ;;  %v850_v1 = vld [vmem:[%s1247_s1 + $0x30] sm:$0xff]  ;;  %s1263_s13 = smov (!%p357_p11, %s803_s13), 15  ;;  %v849_v2 = vld [vmem:[%s1247_s1 + $0x28] sm:$0xff] }
  0x15   : > { %529 = vmatpush.bf16.msra.mxu0 %v851_v0  ;;  %891 = vmatpush.bf16.msra.mxu1 %v851_v0  ;;  %s804_s16 = sshll.u32 %s1263_s13, 2  ;;  %v848_v4 = vld [vmem:[%s1247_s1 + $0x20] sm:$0xff]  ;;  %v847_v14 = vld [vmem:[%s1247_s1 + $0x18] sm:$0xff]  ;;  %v846_v24 = vld [vmem:[%s1247_s1 + $0x10] sm:$0xff]  ;;  %s1197_s13 = scalar_lea.vmem [#allocation3], %s802_s15 }
  0x16   : > { %892 = vmatpush.bf16.msra.mxu2 %v851_v0  ;;  %893 = vmatpush.bf16.msra.mxu3 %v851_v0  ;;  %s363_s27 = scalar_lea.vmem %s1246_s0, %s804_s16  ;;  %v972_v9 = vld [vmem:[%s1248_s2] ss:$0 sm:$0xff]  ;;  %v845_v33 = vld [vmem:[%s1247_s1 + $0x8] sm:$0xff]  ;;  %s387_s12 = scalar_lea.vmem %s1250_s4, %s804_s16 }
  0x17   : > { %v854_v3 = vld [vmem:[%s363_s27] sm:$0xff]   ;;  %v885_v5 = vld [vmem:[%s363_s27 + $0x8] sm:$0xff]   ;;  %v886_v6 = vld [vmem:[%s363_s27 + $0x10] sm:$0xff]   ;;  %s852_s16 = sshll.u32 %s1045_s24, 6  ;;  %s643_s24 = sshll.u32 %s1197_s13, 4  ;;  %s644_s24 = int_to_ptr.vmem [resolvable:$true] %s643_s24 }
  0x18   : > { %v887_v7 = vld [vmem:[%s363_s27 + $0x18] sm:$0xff]   ;;  %v855_v8 = vunpack.c.l.bf16 %v854_v3  ;;  %v856_v10 = vunpack.c.h.bf16 %v854_v3  ;;  %v859_v11 = vunpack.c.l.bf16 %v885_v5  ;;  %v860_v12 = vunpack.c.h.bf16 %v885_v5  ;;  %v973_v19 = vld [vmem:[%s1249_s3] ss:$0 sm:$0xff]  ;;  %v888_v51 = vld [vmem:[%s387_s12 + $0x8] sm:$0xff]   ;;  %s642_s27 = scalar_lea.hbm %s1252_s6, %s852_s16 }
  0x19   : > { %530 = vmatpush.bf16.msra.mxu0 %v850_v1  ;;  %894 = vmatpush.bf16.msra.mxu1 %v850_v1  ;;  %v863_v13 = vunpack.c.l.bf16 %v886_v6  ;;  %v864_v15 = vunpack.c.h.bf16 %v886_v6  ;;  %v867_v16 = vunpack.c.l.bf16 %v887_v7  ;;  %v868_v17 = vunpack.c.h.bf16 %v887_v7  ;;  %v844_v41 = vld [vmem:[%s1247_s1] sm:$0xff]  ;;  %v889_v59 = vld [vmem:[%s387_s12 + $0x10] sm:$0xff]   ;;  %v890_v60 = vld [vmem:[%s387_s12 + $0x18] sm:$0xff]   ;;  %s645_s28 = sshll.u32 %s642_s27, 4  ;;  %s646_s28 = int_to_ptr.hbm [resolvable:$true] %s645_s28 }
  0x1a   : > { %895 = vmatpush.bf16.msra.mxu2 %v850_v1  ;;  %896 = vmatpush.bf16.msra.mxu3 %v850_v1  ;;  %v425_v18 = vmul.f32 %v972_v9, %v855_v8  ;;  %v426_v20 = vmul.f32 %v972_v9, %v856_v10  ;;  %v427_v21 = vmul.f32 %v972_v9, %v859_v11  ;;  %v870_v50 = vld [vmem:[%s387_s12] sm:$0xff]   ;;  %v875_v53 = vunpack.c.l.bf16 %v888_v51  ;;  %s989_s8 = sshra.s32 %s646_s28, 4  ;;  %s990_s8 = int_to_ptr.hbm [resolvable:$true] %s989_s8 }
  0x1b   : > { %v428_v22 = vmul.f32 %v972_v9, %v860_v12  ;;  %v429_v23 = vmul.f32 %v972_v9, %v863_v13  ;;  %v430_v25 = vmul.f32 %v972_v9, %v864_v15  ;;  %v431_v26 = vmul.f32 %v972_v9, %v867_v16  ;;  %v974_v54 = vld [vmem:[%s1251_s5] ss:$0 sm:$0xff]  ;;  %s991_s11 = scalar_lea.hbm %s990_s8, 64  ;;  %p996_p1 = scmp.lt.s32.totalorder %s990_s8, %s1252_s6 }
  0x1c   : > { %v432_v27 = vmul.f32 %v972_v9, %v868_v17  ;;  %v437_v28 = vadd.f32 %v973_v19, %v425_v18  ;;  %v438_v29 = vadd.f32 %v973_v19, %v426_v20  ;;  %v439_v30 = vadd.f32 %v973_v19, %v427_v21  ;;  %p992_p12 = scmp.ne.s32.totalorder %s990_s8, %s991_s11  ;;  %p997_p2 = scmp.lt.s32.totalorder %s995_s17, %s991_s11 }
  0x1d   : > { %531 = vmatpush.bf16.msra.mxu0 %v849_v2  ;;  %897 = vmatpush.bf16.msra.mxu1 %v849_v2  ;;  %v440_v31 = vadd.f32 %v973_v19, %v428_v22  ;;  %v441_v32 = vadd.f32 %v973_v19, %v429_v23  ;;  %v442_v34 = vadd.f32 %v973_v19, %v430_v25  ;;  %v871_v52 = vunpack.c.l.bf16 %v870_v50 }
  0x1e   : > { %898 = vmatpush.bf16.msra.mxu2 %v849_v2  ;;  %899 = vmatpush.bf16.msra.mxu3 %v849_v2  ;;  %v443_v35 = vadd.f32 %v973_v19, %v431_v26  ;;  %v444_v36 = vadd.f32 %v973_v19, %v432_v27  ;;  %v445_v37 = vmax.f32 %v437_v28, 0.0  ;;  %v446_v38 = vmax.f32 %v438_v29, 0.0  ;;  %p993_p13 = pnand %p992_p12, %p1132_p4  ;;  %p998_p3 = por %p997_p2, %p996_p1 }
  0x1f   : > { %v447_v39 = vmax.f32 %v439_v30, 0.0  ;;  %v448_v40 = vmax.f32 %v440_v31, 0.0  ;;  %v449_v42 = vmax.f32 %v441_v32, 0.0  ;;  %v450_v43 = vmax.f32 %v442_v34, 0.0 }
  0x20   : > { %v451_v44 = vmax.f32 %v443_v35, 0.0  ;;  %v452_v45 = vmax.f32 %v444_v36, 0.0  ;;  %v453_v46 = vpack.c.bf16 %v446_v38, %v445_v37  ;;  %v879_v63 = vunpack.c.l.bf16 %v889_v59  ;;  %p994_p0 = pneg %p993_p13 }
  0x21   : > { %532 = vmatpush.bf16.msra.mxu0 %v848_v4  ;;  %900 = vmatpush.bf16.msra.mxu1 %v848_v4  ;;  %v454_v47 = vpack.c.bf16 %v448_v40, %v447_v39  ;;  %v455_v48 = vpack.c.bf16 %v450_v43, %v449_v42  ;;  %v883_v0 = vunpack.c.l.bf16 %v890_v60  ;;  %v872_v1 = vunpack.c.h.bf16 %v870_v50 }
  0x22   : > { %901 = vmatpush.bf16.msra.mxu2 %v848_v4  ;;  %902 = vmatpush.bf16.msra.mxu3 %v848_v4  ;;  %v456_v49 = vpack.c.bf16 %v452_v45, %v451_v44  ;;  %v876_v2 = vunpack.c.h.bf16 %v888_v51  ;;  %v880_v15 = vunpack.c.h.bf16 %v889_v59  ;;  %v884_v16 = vunpack.c.h.bf16 %v890_v60  ;;  %p999_p5 = pnand %p998_p3, %p994_p0 }
  0x25   : > { %533 = vmatpush.bf16.msra.mxu0 %v847_v14  ;;  %903 = vmatpush.bf16.msra.mxu1 %v847_v14 }
  0x26   : > { %904 = vmatpush.bf16.msra.mxu2 %v847_v14  ;;  %905 = vmatpush.bf16.msra.mxu3 %v847_v14 }
  0x29   : > { %534 = vmatpush.bf16.msra.mxu0 %v846_v24  ;;  %906 = vmatpush.bf16.msra.mxu1 %v846_v24 }
  0x2a   : > { %907 = vmatpush.bf16.msra.mxu2 %v846_v24  ;;  %908 = vmatpush.bf16.msra.mxu3 %v846_v24 }
  0x2d   : > { %535 = vmatpush.bf16.msra.mxu0 %v845_v33  ;;  %909 = vmatpush.bf16.msra.mxu1 %v845_v33 }
  0x2e   : > { %910 = vmatpush.bf16.msra.mxu2 %v845_v33  ;;  %911 = vmatpush.bf16.msra.mxu3 %v845_v33 }
  0x31   : > { %536 = vmatpush.bf16.msra.mxu0 %v844_v41  ;;  %912 = vmatpush.bf16.msra.mxu1 %v844_v41 }
  0x32   : > { %913 = vmatpush.bf16.msra.mxu2 %v844_v41  ;;  %914 = vmatpush.bf16.msra.mxu3 %v844_v41 }
  0x34   : > { %537 = vmatmul.bf16.vlgmr.msra.gmra.mxu0 %v453_v46  ;;  %542 = vmatmul.bf16.vlgmr.msra.gmra.mxu1 %v454_v47 }
  0x35   : > { %547 = vmatmul.bf16.vlgmr.msra.gmra.mxu2 %v455_v48  ;;  %552 = vmatmul.bf16.vlgmr.msra.gmra.mxu3 %v456_v49 }
  0xb1   : > { %v538_v55 = vpop.f32.mrf.mxu0  ;;  %v543_v56 = vpop.f32.mrf.mxu1 }
  0xb2   : > { %v601_v57 = vadd.f32 %v871_v52, %v538_v55  ;;  %v603_v58 = vadd.f32 %v875_v53, %v543_v56 }
  0xb4   : > { %v613_v61 = vmul.f32 %v974_v54, %v601_v57  ;;  %v615_v62 = vmul.f32 %v974_v54, %v603_v58 }
  0xb6   : > { %621 = vst [vmem:[%s1197_s13] sm:$0xff] %v613_v61 }
  0xb7   : > { %623 = vst [vmem:[%s1197_s13 + $0x10] sm:$0xff] %v615_v62 }
  0xb8   : > { %v548_v3 = vpop.f32.mrf.mxu2  ;;  %v553_v4 = vpop.f32.mrf.mxu3 }
  0xb9   : > { %v605_v5 = vadd.f32 %v879_v63, %v548_v3  ;;  %v607_v6 = vadd.f32 %v883_v0, %v553_v4  ;;  %v540_v7 = vpop.f32.mrf.mxu0  ;;  %v545_v8 = vpop.f32.mrf.mxu1 }
  0xba   : > { %v602_v9 = vadd.f32 %v872_v1, %v540_v7  ;;  %v604_v10 = vadd.f32 %v876_v2, %v545_v8 }
  0xbb   : > { %v617_v11 = vmul.f32 %v974_v54, %v605_v5  ;;  %v619_v12 = vmul.f32 %v974_v54, %v607_v6 }
  0xbc   : > { %v614_v13 = vmul.f32 %v974_v54, %v602_v9  ;;  %v616_v14 = vmul.f32 %v974_v54, %v604_v10 }
  0xbd   : > { %625 = vst [vmem:[%s1197_s13 + $0x20] sm:$0xff] %v617_v11 }
  0xbe   : > { %627 = vst [vmem:[%s1197_s13 + $0x30] sm:$0xff] %v619_v12 }
  0xbf   : > { %622 = vst [vmem:[%s1197_s13 + $0x8] sm:$0xff] %v614_v13 }
  0xc0   : > { %624 = vst [vmem:[%s1197_s13 + $0x18] sm:$0xff] %v616_v14  ;;  %v550_v17 = vpop.f32.mrf.mxu2  ;;  %v555_v18 = vpop.f32.mrf.mxu3 }
  0xc1   : > { %v606_v19 = vadd.f32 %v880_v15, %v550_v17  ;;  %v608_v20 = vadd.f32 %v884_v16, %v555_v18 }
  0xc3   : > { %v618_v21 = vmul.f32 %v974_v54, %v606_v19  ;;  %v620_v22 = vmul.f32 %v974_v54, %v608_v20 }
  0xc5   : > { %626 = vst [vmem:[%s1197_s13 + $0x28] sm:$0xff] %v618_v21 }
  0xc6   : > { %628 = vst [vmem:[%s1197_s13 + $0x38] sm:$0xff] %v620_v22 }
  0xc7   : > { %1002 = shalt.err (!%p999_p5)
}
  0xc8   : > { %s1055_s14 = smov 128   ;;  %s1056_s13 = smov 8  }
  0xc9   : > { %915 = dma.vmem_to_hbm [thread:$0]  (%p1132_p4), %s644_s24, 1024, %s646_s28, %s630_s30, %s1055_s14, %s1055_s14, %s1056_s13  }
  0xca PF: > { %p921_p6 = scmp.ge.s32.totalorder %s1053_s26, 2  ;;  %s660_s19 = sand.u32 1, %s1033_s21  }
  0xcb   : > { %s661_s20 = scalar_lea.sflag [#allocation4], %s660_s19 }
  0xcc   : > { %p918_p7 = pnand %p921_p6, %p1139_p8 }
  0xce   : > { %p919_p9 = pneg %p918_p7 }
  0xd0   : > { %1028 = dma.done.wait (%p919_p9), %s661_s20, 1024  }
  0xd1   : > { %1030 = vsyncadd (%p919_p9), %s661_s20, 4294966272  ;;  %s19_s26 = sadd.s32 1, %s1053_s26   ;;  %s1255_s21 = smov %s1037_s22 }
  0xd2   : > { %p16_p10 = scmp.ge.s32.totalorder %s19_s26, 4   ;;  %s1256_s22 = smov %s1041_s23 }
  0xd3   : > { %s1257_s23 = smov %s1145_s10  ;;  %s1258_s24 = smov %s1049_s25 }
  0xd4   : > { %s1259_s25 = smov %s1261_s29  ;;  %18 = sbr.rel (!%p16_p10) target bundleno = 4 (0x4), region = 102 }
  0xd9   :  { %667 = vsyncpa [#allocation4], 1 }
  0xda   :  { %669 = vsyncpa [#allocation4 + $0x1], 1 }

</bundles_post_ra>
